<compile_context>
chip_gen: v7x
topology: tpu7x:2x2x1
jax: 0.10.0
libtpu: 0.0.40
codegen_flags: <defaults>
</compile_context>

<pallas_src>
import functools

import jax
import jax.numpy as jnp
from jax import lax
from jax.experimental import pallas as pl
from jax.experimental.pallas import tpu as pltpu


def _afa_kernel(x_ref, w1_ref, b1_ref, w2_ref, b2_ref, o_ref, *, use_softmax, mm_dtype):
    # x_ref block: (M, C, G) -- M neighbor-rows x C channels x G groups (lane axis).
    M, C, G = x_ref.shape
    H = w1_ref.shape[0]
    f32 = jnp.float32

    w1 = w1_ref[...].astype(mm_dtype)                          # (H, C)
    w2 = w2_ref[...].astype(mm_dtype)                          # (C, H)
    # Only (., G)-wide bias broadcasts, hoisted once (never (., M*G)).
    b1g = jnp.broadcast_to(b1_ref[...].astype(f32), (H, G))
    b2g = jnp.broadcast_to(b2_ref[...].astype(f32), (C, G))

    # All M neighbor columns, lane-dense (C, G), static leading-dim reads.
    cols = [x_ref[m].astype(f32) for m in range(M)]

    # Linearity of the first 1x1 conv: compute u_j = w1 @ x_j for all j with ONE wide
    # matmul instead of one (H, C) x (C, M*G) matmul per i.
    xcat = jnp.concatenate(cols, axis=1).astype(mm_dtype)      # (C, M*G)
    u = jnp.dot(w1, xcat, preferred_element_type=f32)          # (H, M*G)
    u_cols = [u[:, j * G:(j + 1) * G] for j in range(M)]       # M x (H, G)

    for i in range(M):
        # Layer-1 pre-activation for row i, all j and all G groups:
        #   w1 @ f[i, j] + b1 = (u_i + b1) - u_j   (j != i)
        #                     = (u_i + b1)          (j == i)   [since f[i,i] = x_i]
        a_i = u_cols[i] + b1g                                   # (H, G)
        h_i = jnp.concatenate(
            [a_i if j == i else a_i - u_cols[j] for j in range(M)], axis=1)
        h_i = jnp.maximum(h_i, 0.0)                             # (H, M*G)

        # Layer 2: one wide (C, H) x (H, M*G) matmul (bias handled below).
        w_i = jnp.dot(w2, h_i.astype(mm_dtype), preferred_element_type=f32)  # (C, M*G)

        x_i = cols[i]
        if use_softmax:
            # softmax over j is invariant to the per-(c, g) bias b2 -> drop it exactly.
            m_max = w_i[:, 0:G]
            for j in range(1, M):
                m_max = jnp.maximum(m_max, w_i[:, j * G:(j + 1) * G])
            num = jnp.zeros((C, G), f32)
            den = jnp.zeros((C, G), f32)
            for j in range(M):
                e = jnp.exp(w_i[:, j * G:(j + 1) * G] - m_max)
                f_j = x_i if j == i else x_i - cols[j]          # recomputed, (C, G)
                den = den + e
                num = num + f_j * e
            out_i = num * pl.reciprocal(den, approx=False)
        else:
            # sum_j f_j * (w_j + b2) = sum_j f_j * w_j + b2 * sum_j f_j
            acc = x_i * w_i[:, i * G:(i + 1) * G]
            fsum = x_i
            for j in range(M):
                if j == i:
                    continue
                f_j = x_i - cols[j]
                acc = acc + f_j * w_i[:, j * G:(j + 1) * G]
                fsum = fsum + f_j
            out_i = acc + b2g * fsum

        # Lane-dense (C, G) store into row i of the output block.
        o_ref[i] = out_i.astype(o_ref.dtype)


def _round_up(x, m):
    return (x + m - 1) // m * m


def _choose_group_size(BN, C, H, M):
    """Pick G (multiple of 128): fit a VMEM budget, minimize tail padding, keep >=2 steps."""
    # Rough f32 bytes per lane-group: double-buffered in/out blocks, cols, xcat, u, h_i,
    # w_i plus a handful of (., G) temporaries.
    bytes_per_group = 4 * (M * (7 * C + 3 * H) + 8 * (C + H))
    budget = 12 * 1024 * 1024     # comfortably under every generation's scoped-VMEM default
    g_max = max(128, min(2048, (budget // bytes_per_group) // 128 * 128))

    bn128 = _round_up(BN, 128)
    if bn128 >= 256:
        # Keep at least 2 grid steps so the "parallel" axis can shard over both v7x TCs.
        g_max = min(g_max, max(128, (bn128 // 2) // 128 * 128))

    best_g, best_pad = 128, _round_up(BN, 128) - BN
    for g in range(128, g_max + 1, 128):
        pad = _round_up(BN, g) - BN
        if pad < best_pad or (pad == best_pad and g > best_g):
            best_g, best_pad = g, pad
    return best_g


def afa_module_pallas(x, w1, b1, w2, b2, *, use_softmax=False):
    """x: (B, C, N, M) float32 -> (B, C, N, M) float32."""
    B, C, N, M = x.shape
    H, Cw = w1.shape
    # Only the canonical Conv2d(C,H,1)->ReLU->Conv2d(H,C,1) MLP is supported.
    assert Cw == C and w2.shape == (C, H), "unsupported mlp shape for _AFAModule"
    BN = B * N

    G = _choose_group_size(BN, C, H, M)
    BNp = _round_up(BN, G)

    # (B, C, N, M) -> (M, C, B, N) -> (M, C, B*N); zero-pad the group axis to BNp.
    # TODO(synk): these HBM transposes could be fused into producer/consumer ops if the
    #             surrounding model can emit/consume the (M, C, B*N) slab directly.
    xg = jnp.transpose(x, (3, 1, 0, 2)).reshape(M, C, BN)
    if BNp != BN:
        xg = jnp.pad(xg, ((0, 0), (0, 0), (0, BNp - BN)))

    # bf16 MXU operands only when the channel dims are large enough to be MXU-bound;
    # elementwise math stays f32 everywhere (v5e has no bf16 VPU/EUP).
    mm_dtype = jnp.bfloat16 if (C >= 32 and H >= 32) else jnp.float32

    kernel = functools.partial(_afa_kernel, use_softmax=use_softmax, mm_dtype=mm_dtype)
    b1c = b1.reshape(H, 1).astype(jnp.float32)
    b2c = b2.reshape(C, 1).astype(jnp.float32)

    out_flat = pl.pallas_call(
        kernel,
        out_shape=jax.ShapeDtypeStruct((M, C, BNp), jnp.float32),
        grid_spec=pltpu.PrefetchScalarGridSpec(
            num_scalar_prefetch=0,
            grid=(BNp // G,),
            in_specs=[
                pl.BlockSpec((M, C, G), lambda g: (0, 0, g)),
                pl.BlockSpec((H, C), lambda g: (0, 0)),
                pl.BlockSpec((H, 1), lambda g: (0, 0)),
                pl.BlockSpec((C, H), lambda g: (0, 0)),
                pl.BlockSpec((C, 1), lambda g: (0, 0)),
            ],
            out_specs=pl.BlockSpec((M, C, G), lambda g: (0, 0, g)),
        ),
        compiler_params=pltpu.CompilerParams(
            # Group-chunk axis is embarrassingly parallel (v7x: shard over both TCs).
            dimension_semantics=("parallel",),
            # Safe on all generations (v7x physical VMEM is 64 MiB); gives headroom for
            # larger adaptive G on real PointWeb channel counts.
            vmem_limit_bytes=32 * 1024 * 1024,
        ),
    )(xg, w1.astype(jnp.float32), b1c, w2.astype(jnp.float32), b2c)

    # (M, C, BNp) -> (M, C, B, N) -> (B, C, N, M)
    out = out_flat[:, :, :BN].reshape(M, C, B, N)
    return jnp.transpose(out, (2, 1, 3, 0))


def afa_module_ref(x, w1, b1, w2, b2, *, use_softmax=False):
    """Pure-JAX reference mirroring the PyTorch forward exactly."""
    B, C, N, M = x.shape
    xt = jnp.transpose(x, (0, 2, 1, 3)).reshape(B * N, C, M)
    eye = jnp.eye(M, dtype=x.dtype)
    fi = xt[:, :, :, None]                      # (BN, C, M, 1) -> i axis
    fj = xt[:, :, None, :]                      # (BN, C, 1, M) -> j axis
    f = fi - fj + fi * eye[None, None]          # (BN, C, M, M)
    # mlp: Conv2d(C,H,1) -> ReLU -> Conv2d(H,C,1)
    h = jnp.einsum("hc,gcij->ghij", w1, f,
                   precision=lax.Precision.HIGHEST) + b1.reshape(1, -1, 1, 1)
    h = jnp.maximum(h, 0.0)
    w = jnp.einsum("ch,ghij->gcij", w2, h,
                   precision=lax.Precision.HIGHEST) + b2.reshape(1, -1, 1, 1)
    if use_softmax:
        w = jax.nn.softmax(w, axis=-1)
    out = (f * w).sum(-1)                       # (BN, C, M)
    return jnp.transpose(out.reshape(B, N, C, M), (0, 2, 1, 3))


if __name__ == "__main__":
    B, C, N, M = 2, 4, 16, 8
    H = 16  # hidden width of the 1x1-conv MLP

    key = jax.random.PRNGKey(0)
    kx, k1, k2, k3, k4 = jax.random.split(key, 5)
    x = jax.random.normal(kx, (B, C, N, M), dtype=jnp.float32)
    w1 = jax.random.normal(k1, (H, C), dtype=jnp.float32) * 0.2
    b1 = jax.random.normal(k2, (H, 1), dtype=jnp.float32) * 0.05
    w2 = jax.random.normal(k3, (C, H), dtype=jnp.float32) * 0.2
    b2 = jax.random.normal(k4, (C, 1), dtype=jnp.float32) * 0.05

    # Default (no-softmax) path.
    out = jax.block_until_ready(afa_module_pallas(x, w1, b1, w2, b2, use_softmax=False))
    ref = afa_module_ref(x, w1, b1, w2, b2, use_softmax=False)
    assert out.shape == (B, C, N, M)
    if not jnp.allclose(out, ref, rtol=1e-4, atol=1e-4):
        raise AssertionError("Pallas kernel disagrees with JAX reference (no softmax)")

    # Softmax path (exact reciprocal in the kernel).
    out_sm = jax.block_until_ready(afa_module_pallas(x, w1, b1, w2, b2, use_softmax=True))
    ref_sm = afa_module_ref(x, w1, b1, w2, b2, use_softmax=True)
    if not jnp.allclose(out_sm, ref_sm, rtol=1e-3, atol=1e-4):
        raise AssertionError("Pallas kernel disagrees with JAX reference (softmax)")

    print("KERNEL_OK")
</pallas_src>

<mosaic_0001>
module attributes {stable_mosaic.version = 11 : i64} {
  func.func @_afa_kernel(%arg0: i32, %arg1: memref<8x4x128xf32, #tpu.memory_space<vmem>>, %arg2: memref<16x4xf32, #tpu.memory_space<vmem>>, %arg3: memref<16x1xf32, #tpu.memory_space<vmem>>, %arg4: memref<4x16xf32, #tpu.memory_space<vmem>>, %arg5: memref<4x1xf32, #tpu.memory_space<vmem>>, %arg6: memref<8x4x128xf32, #tpu.memory_space<vmem>>) attributes {dimension_semantics = [#tpu.dimension_semantics<parallel>], iteration_bounds = array<i64: 1>, scalar_prefetch = 0 : i64, scratch_operands = 0 : i64, tpu.core_type = #tpu.core_type<tc>, window_params = [{transform_indices = @transform_0, window_bounds = array<i64: 8, 4, 128>}, {pipeline_mode = #tpu.pipeline_mode<synchronous>, transform_indices = @transform_1, window_bounds = array<i64: 16, 4>}, {pipeline_mode = #tpu.pipeline_mode<synchronous>, transform_indices = @transform_2, window_bounds = array<i64: 16, 1>}, {pipeline_mode = #tpu.pipeline_mode<synchronous>, transform_indices = @transform_3, window_bounds = array<i64: 4, 16>}, {pipeline_mode = #tpu.pipeline_mode<synchronous>, transform_indices = @transform_4, window_bounds = array<i64: 4, 1>}, {transform_indices = @transform_5, window_bounds = array<i64: 8, 4, 128>}]} {
    %c0 = arith.constant 0 : index
    %c0_0 = arith.constant 0 : index
    %0 = vector.load %arg2[%c0, %c0_0] : memref<16x4xf32, #tpu.memory_space<vmem>>, vector<16x4xf32>
    %c0_1 = arith.constant 0 : index
    %c0_2 = arith.constant 0 : index
    %1 = vector.load %arg4[%c0_1, %c0_2] : memref<4x16xf32, #tpu.memory_space<vmem>>, vector<4x16xf32>
    %c0_3 = arith.constant 0 : index
    %c0_4 = arith.constant 0 : index
    %2 = vector.load %arg3[%c0_3, %c0_4] : memref<16x1xf32, #tpu.memory_space<vmem>>, vector<16x1xf32>
    %3 = vector.shape_cast %2 : vector<16x1xf32> to vector<16x1xf32>
    %4 = vector.broadcast %3 : vector<16x1xf32> to vector<16x128xf32>
    %c0_5 = arith.constant 0 : index
    %c0_6 = arith.constant 0 : index
    %5 = vector.load %arg5[%c0_5, %c0_6] : memref<4x1xf32, #tpu.memory_space<vmem>>, vector<4x1xf32>
    %6 = vector.shape_cast %5 : vector<4x1xf32> to vector<4x1xf32>
    %7 = vector.broadcast %6 : vector<4x1xf32> to vector<4x128xf32>
    %c0_7 = arith.constant 0 : index
    %c0_8 = arith.constant 0 : index
    %c0_9 = arith.constant 0 : index
    %8 = vector.load %arg1[%c0_7, %c0_8, %c0_9] : memref<8x4x128xf32, #tpu.memory_space<vmem>>, vector<1x4x128xf32>
    %9 = vector.shape_cast %8 : vector<1x4x128xf32> to vector<4x128xf32>
    %c1 = arith.constant 1 : index
    %c0_10 = arith.constant 0 : index
    %c0_11 = arith.constant 0 : index
    %10 = vector.load %arg1[%c1, %c0_10, %c0_11] : memref<8x4x128xf32, #tpu.memory_space<vmem>>, vector<1x4x128xf32>
    %11 = vector.shape_cast %10 : vector<1x4x128xf32> to vector<4x128xf32>
    %c2 = arith.constant 2 : index
    %c0_12 = arith.constant 0 : index
    %c0_13 = arith.constant 0 : index
    %12 = vector.load %arg1[%c2, %c0_12, %c0_13] : memref<8x4x128xf32, #tpu.memory_space<vmem>>, vector<1x4x128xf32>
    %13 = vector.shape_cast %12 : vector<1x4x128xf32> to vector<4x128xf32>
    %c3 = arith.constant 3 : index
    %c0_14 = arith.constant 0 : index
    %c0_15 = arith.constant 0 : index
    %14 = vector.load %arg1[%c3, %c0_14, %c0_15] : memref<8x4x128xf32, #tpu.memory_space<vmem>>, vector<1x4x128xf32>
    %15 = vector.shape_cast %14 : vector<1x4x128xf32> to vector<4x128xf32>
    %c4 = arith.constant 4 : index
    %c0_16 = arith.constant 0 : index
    %c0_17 = arith.constant 0 : index
    %16 = vector.load %arg1[%c4, %c0_16, %c0_17] : memref<8x4x128xf32, #tpu.memory_space<vmem>>, vector<1x4x128xf32>
    %17 = vector.shape_cast %16 : vector<1x4x128xf32> to vector<4x128xf32>
    %c5 = arith.constant 5 : index
    %c0_18 = arith.constant 0 : index
    %c0_19 = arith.constant 0 : index
    %18 = vector.load %arg1[%c5, %c0_18, %c0_19] : memref<8x4x128xf32, #tpu.memory_space<vmem>>, vector<1x4x128xf32>
    %19 = vector.shape_cast %18 : vector<1x4x128xf32> to vector<4x128xf32>
    %c6 = arith.constant 6 : index
    %c0_20 = arith.constant 0 : index
    %c0_21 = arith.constant 0 : index
    %20 = vector.load %arg1[%c6, %c0_20, %c0_21] : memref<8x4x128xf32, #tpu.memory_space<vmem>>, vector<1x4x128xf32>
    %21 = vector.shape_cast %20 : vector<1x4x128xf32> to vector<4x128xf32>
    %c7 = arith.constant 7 : index
    %c0_22 = arith.constant 0 : index
    %c0_23 = arith.constant 0 : index
    %22 = vector.load %arg1[%c7, %c0_22, %c0_23] : memref<8x4x128xf32, #tpu.memory_space<vmem>>, vector<1x4x128xf32>
    %23 = vector.shape_cast %22 : vector<1x4x128xf32> to vector<4x128xf32>
    %24 = tpu.concatenate %9, %11, %13, %15, %17, %19, %21, %23 in 1 : vector<4x128xf32>, vector<4x128xf32>, vector<4x128xf32>, vector<4x128xf32>, vector<4x128xf32>, vector<4x128xf32>, vector<4x128xf32>, vector<4x128xf32> -> vector<4x1024xf32>
    %cst = arith.constant dense<0.000000e+00> : vector<16x1024xf32>
    %25 = tpu.matmul %0, %24, %cst {dimension_numbers = #tpu.dot_dimension_numbers<[1], [0], [0], [1], [0, 0, 1, 1], [], []>} : vector<16x4xf32>, vector<4x1024xf32>, vector<16x1024xf32> -> vector<16x1024xf32>
    %26 = vector.extract_strided_slice %25 {offsets = [0, 0], sizes = [16, 128], strides = [1, 1]} : vector<16x1024xf32> to vector<16x128xf32>
    %27 = vector.extract_strided_slice %25 {offsets = [0, 128], sizes = [16, 128], strides = [1, 1]} : vector<16x1024xf32> to vector<16x128xf32>
    %28 = vector.extract_strided_slice %25 {offsets = [0, 256], sizes = [16, 128], strides = [1, 1]} : vector<16x1024xf32> to vector<16x128xf32>
    %29 = vector.extract_strided_slice %25 {offsets = [0, 384], sizes = [16, 128], strides = [1, 1]} : vector<16x1024xf32> to vector<16x128xf32>
    %30 = vector.extract_strided_slice %25 {offsets = [0, 512], sizes = [16, 128], strides = [1, 1]} : vector<16x1024xf32> to vector<16x128xf32>
    %31 = vector.extract_strided_slice %25 {offsets = [0, 640], sizes = [16, 128], strides = [1, 1]} : vector<16x1024xf32> to vector<16x128xf32>
    %32 = vector.extract_strided_slice %25 {offsets = [0, 768], sizes = [16, 128], strides = [1, 1]} : vector<16x1024xf32> to vector<16x128xf32>
    %33 = vector.extract_strided_slice %25 {offsets = [0, 896], sizes = [16, 128], strides = [1, 1]} : vector<16x1024xf32> to vector<16x128xf32>
    %34 = arith.addf %26, %4 : vector<16x128xf32>
    %35 = arith.subf %34, %27 : vector<16x128xf32>
    %36 = arith.subf %34, %28 : vector<16x128xf32>
    %37 = arith.subf %34, %29 : vector<16x128xf32>
    %38 = arith.subf %34, %30 : vector<16x128xf32>
    %39 = arith.subf %34, %31 : vector<16x128xf32>
    %40 = arith.subf %34, %32 : vector<16x128xf32>
    %41 = arith.subf %34, %33 : vector<16x128xf32>
    %42 = tpu.concatenate %34, %35, %36, %37, %38, %39, %40, %41 in 1 : vector<16x128xf32>, vector<16x128xf32>, vector<16x128xf32>, vector<16x128xf32>, vector<16x128xf32>, vector<16x128xf32>, vector<16x128xf32>, vector<16x128xf32> -> vector<16x1024xf32>
    %cst_24 = arith.constant 0.000000e+00 : f32
    %43 = vector.broadcast %cst_24 : f32 to vector<16x1024xf32>
    %44 = arith.maximumf %42, %43 : vector<16x1024xf32>
    %cst_25 = arith.constant dense<0.000000e+00> : vector<4x1024xf32>
    %45 = tpu.matmul %1, %44, %cst_25 {dimension_numbers = #tpu.dot_dimension_numbers<[1], [0], [0], [1], [0, 0, 1, 1], [], []>} : vector<4x16xf32>, vector<16x1024xf32>, vector<4x1024xf32> -> vector<4x1024xf32>
    %46 = vector.extract_strided_slice %45 {offsets = [0, 0], sizes = [4, 128], strides = [1, 1]} : vector<4x1024xf32> to vector<4x128xf32>
    %47 = arith.mulf %9, %46 : vector<4x128xf32>
    %48 = arith.subf %9, %11 : vector<4x128xf32>
    %49 = vector.extract_strided_slice %45 {offsets = [0, 128], sizes = [4, 128], strides = [1, 1]} : vector<4x1024xf32> to vector<4x128xf32>
    %50 = arith.mulf %48, %49 : vector<4x128xf32>
    %51 = arith.addf %47, %50 : vector<4x128xf32>
    %52 = arith.addf %9, %48 : vector<4x128xf32>
    %53 = arith.subf %9, %13 : vector<4x128xf32>
    %54 = vector.extract_strided_slice %45 {offsets = [0, 256], sizes = [4, 128], strides = [1, 1]} : vector<4x1024xf32> to vector<4x128xf32>
    %55 = arith.mulf %53, %54 : vector<4x128xf32>
    %56 = arith.addf %51, %55 : vector<4x128xf32>
    %57 = arith.addf %52, %53 : vector<4x128xf32>
    %58 = arith.subf %9, %15 : vector<4x128xf32>
    %59 = vector.extract_strided_slice %45 {offsets = [0, 384], sizes = [4, 128], strides = [1, 1]} : vector<4x1024xf32> to vector<4x128xf32>
    %60 = arith.mulf %58, %59 : vector<4x128xf32>
    %61 = arith.addf %56, %60 : vector<4x128xf32>
    %62 = arith.addf %57, %58 : vector<4x128xf32>
    %63 = arith.subf %9, %17 : vector<4x128xf32>
    %64 = vector.extract_strided_slice %45 {offsets = [0, 512], sizes = [4, 128], strides = [1, 1]} : vector<4x1024xf32> to vector<4x128xf32>
    %65 = arith.mulf %63, %64 : vector<4x128xf32>
    %66 = arith.addf %61, %65 : vector<4x128xf32>
    %67 = arith.addf %62, %63 : vector<4x128xf32>
    %68 = arith.subf %9, %19 : vector<4x128xf32>
    %69 = vector.extract_strided_slice %45 {offsets = [0, 640], sizes = [4, 128], strides = [1, 1]} : vector<4x1024xf32> to vector<4x128xf32>
    %70 = arith.mulf %68, %69 : vector<4x128xf32>
    %71 = arith.addf %66, %70 : vector<4x128xf32>
    %72 = arith.addf %67, %68 : vector<4x128xf32>
    %73 = arith.subf %9, %21 : vector<4x128xf32>
    %74 = vector.extract_strided_slice %45 {offsets = [0, 768], sizes = [4, 128], strides = [1, 1]} : vector<4x1024xf32> to vector<4x128xf32>
    %75 = arith.mulf %73, %74 : vector<4x128xf32>
    %76 = arith.addf %71, %75 : vector<4x128xf32>
    %77 = arith.addf %72, %73 : vector<4x128xf32>
    %78 = arith.subf %9, %23 : vector<4x128xf32>
    %79 = vector.extract_strided_slice %45 {offsets = [0, 896], sizes = [4, 128], strides = [1, 1]} : vector<4x1024xf32> to vector<4x128xf32>
    %80 = arith.mulf %78, %79 : vector<4x128xf32>
    %81 = arith.addf %76, %80 : vector<4x128xf32>
    %82 = arith.addf %77, %78 : vector<4x128xf32>
    %83 = arith.mulf %7, %82 : vector<4x128xf32>
    %84 = arith.addf %81, %83 : vector<4x128xf32>
    %c0_26 = arith.constant 0 : index
    %c0_27 = arith.constant 0 : index
    %c0_28 = arith.constant 0 : index
    %85 = vector.load %arg6[%c0_26, %c0_27, %c0_28] : memref<8x4x128xf32, #tpu.memory_space<vmem>>, vector<1x4x128xf32>
    %86 = vector.shape_cast %85 : vector<1x4x128xf32> to vector<4x128xf32>
    %87 = vector.shape_cast %84 : vector<4x128xf32> to vector<1x4x128xf32>
    tpu.vector_store %arg6[%c0_26, %c0_27, %c0_28], %87 {strides = array<i32>} : memref<8x4x128xf32, #tpu.memory_space<vmem>>, vector<1x4x128xf32>,
    %88 = arith.addf %27, %4 : vector<16x128xf32>
    %89 = arith.subf %88, %26 : vector<16x128xf32>
    %90 = arith.subf %88, %28 : vector<16x128xf32>
    %91 = arith.subf %88, %29 : vector<16x128xf32>
    %92 = arith.subf %88, %30 : vector<16x128xf32>
    %93 = arith.subf %88, %31 : vector<16x128xf32>
    %94 = arith.subf %88, %32 : vector<16x128xf32>
    %95 = arith.subf %88, %33 : vector<16x128xf32>
    %96 = tpu.concatenate %89, %88, %90, %91, %92, %93, %94, %95 in 1 : vector<16x128xf32>, vector<16x128xf32>, vector<16x128xf32>, vector<16x128xf32>, vector<16x128xf32>, vector<16x128xf32>, vector<16x128xf32>, vector<16x128xf32> -> vector<16x1024xf32>
    %cst_29 = arith.constant 0.000000e+00 : f32
    %97 = vector.broadcast %cst_29 : f32 to vector<16x1024xf32>
    %98 = arith.maximumf %96, %97 : vector<16x1024xf32>
    %cst_30 = arith.constant dense<0.000000e+00> : vector<4x1024xf32>
    %99 = tpu.matmul %1, %98, %cst_30 {dimension_numbers = #tpu.dot_dimension_numbers<[1], [0], [0], [1], [0, 0, 1, 1], [], []>} : vector<4x16xf32>, vector<16x1024xf32>, vector<4x1024xf32> -> vector<4x1024xf32>
    %100 = vector.extract_strided_slice %99 {offsets = [0, 128], sizes = [4, 128], strides = [1, 1]} : vector<4x1024xf32> to vector<4x128xf32>
    %101 = arith.mulf %11, %100 : vector<4x128xf32>
    %102 = arith.subf %11, %9 : vector<4x128xf32>
    %103 = vector.extract_strided_slice %99 {offsets = [0, 0], sizes = [4, 128], strides = [1, 1]} : vector<4x1024xf32> to vector<4x128xf32>
    %104 = arith.mulf %102, %103 : vector<4x128xf32>
    %105 = arith.addf %101, %104 : vector<4x128xf32>
    %106 = arith.addf %11, %102 : vector<4x128xf32>
    %107 = arith.subf %11, %13 : vector<4x128xf32>
    %108 = vector.extract_strided_slice %99 {offsets = [0, 256], sizes = [4, 128], strides = [1, 1]} : vector<4x1024xf32> to vector<4x128xf32>
    %109 = arith.mulf %107, %108 : vector<4x128xf32>
    %110 = arith.addf %105, %109 : vector<4x128xf32>
    %111 = arith.addf %106, %107 : vector<4x128xf32>
    %112 = arith.subf %11, %15 : vector<4x128xf32>
    %113 = vector.extract_strided_slice %99 {offsets = [0, 384], sizes = [4, 128], strides = [1, 1]} : vector<4x1024xf32> to vector<4x128xf32>
    %114 = arith.mulf %112, %113 : vector<4x128xf32>
    %115 = arith.addf %110, %114 : vector<4x128xf32>
    %116 = arith.addf %111, %112 : vector<4x128xf32>
    %117 = arith.subf %11, %17 : vector<4x128xf32>
    %118 = vector.extract_strided_slice %99 {offsets = [0, 512], sizes = [4, 128], strides = [1, 1]} : vector<4x1024xf32> to vector<4x128xf32>
    %119 = arith.mulf %117, %118 : vector<4x128xf32>
    %120 = arith.addf %115, %119 : vector<4x128xf32>
    %121 = arith.addf %116, %117 : vector<4x128xf32>
    %122 = arith.subf %11, %19 : vector<4x128xf32>
    %123 = vector.extract_strided_slice %99 {offsets = [0, 640], sizes = [4, 128], strides = [1, 1]} : vector<4x1024xf32> to vector<4x128xf32>
    %124 = arith.mulf %122, %123 : vector<4x128xf32>
    %125 = arith.addf %120, %124 : vector<4x128xf32>
    %126 = arith.addf %121, %122 : vector<4x128xf32>
    %127 = arith.subf %11, %21 : vector<4x128xf32>
    %128 = vector.extract_strided_slice %99 {offsets = [0, 768], sizes = [4, 128], strides = [1, 1]} : vector<4x1024xf32> to vector<4x128xf32>
    %129 = arith.mulf %127, %128 : vector<4x128xf32>
    %130 = arith.addf %125, %129 : vector<4x128xf32>
    %131 = arith.addf %126, %127 : vector<4x128xf32>
    %132 = arith.subf %11, %23 : vector<4x128xf32>
    %133 = vector.extract_strided_slice %99 {offsets = [0, 896], sizes = [4, 128], strides = [1, 1]} : vector<4x1024xf32> to vector<4x128xf32>
    %134 = arith.mulf %132, %133 : vector<4x128xf32>
    %135 = arith.addf %130, %134 : vector<4x128xf32>
    %136 = arith.addf %131, %132 : vector<4x128xf32>
    %137 = arith.mulf %7, %136 : vector<4x128xf32>
    %138 = arith.addf %135, %137 : vector<4x128xf32>
    %c1_31 = arith.constant 1 : index
    %c0_32 = arith.constant 0 : index
    %c0_33 = arith.constant 0 : index
    %139 = vector.load %arg6[%c1_31, %c0_32, %c0_33] : memref<8x4x128xf32, #tpu.memory_space<vmem>>, vector<1x4x128xf32>
    %140 = vector.shape_cast %139 : vector<1x4x128xf32> to vector<4x128xf32>
    %141 = vector.shape_cast %138 : vector<4x128xf32> to vector<1x4x128xf32>
    tpu.vector_store %arg6[%c1_31, %c0_32, %c0_33], %141 {strides = array<i32>} : memref<8x4x128xf32, #tpu.memory_space<vmem>>, vector<1x4x128xf32>,
    %142 = arith.addf %28, %4 : vector<16x128xf32>
    %143 = arith.subf %142, %26 : vector<16x128xf32>
    %144 = arith.subf %142, %27 : vector<16x128xf32>
    %145 = arith.subf %142, %29 : vector<16x128xf32>
    %146 = arith.subf %142, %30 : vector<16x128xf32>
    %147 = arith.subf %142, %31 : vector<16x128xf32>
    %148 = arith.subf %142, %32 : vector<16x128xf32>
    %149 = arith.subf %142, %33 : vector<16x128xf32>
    %150 = tpu.concatenate %143, %144, %142, %145, %146, %147, %148, %149 in 1 : vector<16x128xf32>, vector<16x128xf32>, vector<16x128xf32>, vector<16x128xf32>, vector<16x128xf32>, vector<16x128xf32>, vector<16x128xf32>, vector<16x128xf32> -> vector<16x1024xf32>
    %cst_34 = arith.constant 0.000000e+00 : f32
    %151 = vector.broadcast %cst_34 : f32 to vector<16x1024xf32>
    %152 = arith.maximumf %150, %151 : vector<16x1024xf32>
    %cst_35 = arith.constant dense<0.000000e+00> : vector<4x1024xf32>
    %153 = tpu.matmul %1, %152, %cst_35 {dimension_numbers = #tpu.dot_dimension_numbers<[1], [0], [0], [1], [0, 0, 1, 1], [], []>} : vector<4x16xf32>, vector<16x1024xf32>, vector<4x1024xf32> -> vector<4x1024xf32>
    %154 = vector.extract_strided_slice %153 {offsets = [0, 256], sizes = [4, 128], strides = [1, 1]} : vector<4x1024xf32> to vector<4x128xf32>
    %155 = arith.mulf %13, %154 : vector<4x128xf32>
    %156 = arith.subf %13, %9 : vector<4x128xf32>
    %157 = vector.extract_strided_slice %153 {offsets = [0, 0], sizes = [4, 128], strides = [1, 1]} : vector<4x1024xf32> to vector<4x128xf32>
    %158 = arith.mulf %156, %157 : vector<4x128xf32>
    %159 = arith.addf %155, %158 : vector<4x128xf32>
    %160 = arith.addf %13, %156 : vector<4x128xf32>
    %161 = arith.subf %13, %11 : vector<4x128xf32>
    %162 = vector.extract_strided_slice %153 {offsets = [0, 128], sizes = [4, 128], strides = [1, 1]} : vector<4x1024xf32> to vector<4x128xf32>
    %163 = arith.mulf %161, %162 : vector<4x128xf32>
    %164 = arith.addf %159, %163 : vector<4x128xf32>
    %165 = arith.addf %160, %161 : vector<4x128xf32>
    %166 = arith.subf %13, %15 : vector<4x128xf32>
    %167 = vector.extract_strided_slice %153 {offsets = [0, 384], sizes = [4, 128], strides = [1, 1]} : vector<4x1024xf32> to vector<4x128xf32>
    %168 = arith.mulf %166, %167 : vector<4x128xf32>
    %169 = arith.addf %164, %168 : vector<4x128xf32>
    %170 = arith.addf %165, %166 : vector<4x128xf32>
    %171 = arith.subf %13, %17 : vector<4x128xf32>
    %172 = vector.extract_strided_slice %153 {offsets = [0, 512], sizes = [4, 128], strides = [1, 1]} : vector<4x1024xf32> to vector<4x128xf32>
    %173 = arith.mulf %171, %172 : vector<4x128xf32>
    %174 = arith.addf %169, %173 : vector<4x128xf32>
    %175 = arith.addf %170, %171 : vector<4x128xf32>
    %176 = arith.subf %13, %19 : vector<4x128xf32>
    %177 = vector.extract_strided_slice %153 {offsets = [0, 640], sizes = [4, 128], strides = [1, 1]} : vector<4x1024xf32> to vector<4x128xf32>
    %178 = arith.mulf %176, %177 : vector<4x128xf32>
    %179 = arith.addf %174, %178 : vector<4x128xf32>
    %180 = arith.addf %175, %176 : vector<4x128xf32>
    %181 = arith.subf %13, %21 : vector<4x128xf32>
    %182 = vector.extract_strided_slice %153 {offsets = [0, 768], sizes = [4, 128], strides = [1, 1]} : vector<4x1024xf32> to vector<4x128xf32>
    %183 = arith.mulf %181, %182 : vector<4x128xf32>
    %184 = arith.addf %179, %183 : vector<4x128xf32>
    %185 = arith.addf %180, %181 : vector<4x128xf32>
    %186 = arith.subf %13, %23 : vector<4x128xf32>
    %187 = vector.extract_strided_slice %153 {offsets = [0, 896], sizes = [4, 128], strides = [1, 1]} : vector<4x1024xf32> to vector<4x128xf32>
    %188 = arith.mulf %186, %187 : vector<4x128xf32>
    %189 = arith.addf %184, %188 : vector<4x128xf32>
    %190 = arith.addf %185, %186 : vector<4x128xf32>
    %191 = arith.mulf %7, %190 : vector<4x128xf32>
    %192 = arith.addf %189, %191 : vector<4x128xf32>
    %c2_36 = arith.constant 2 : index
    %c0_37 = arith.constant 0 : index
    %c0_38 = arith.constant 0 : index
    %193 = vector.load %arg6[%c2_36, %c0_37, %c0_38] : memref<8x4x128xf32, #tpu.memory_space<vmem>>, vector<1x4x128xf32>
    %194 = vector.shape_cast %193 : vector<1x4x128xf32> to vector<4x128xf32>
    %195 = vector.shape_cast %192 : vector<4x128xf32> to vector<1x4x128xf32>
    tpu.vector_store %arg6[%c2_36, %c0_37, %c0_38], %195 {strides = array<i32>} : memref<8x4x128xf32, #tpu.memory_space<vmem>>, vector<1x4x128xf32>,
    %196 = arith.addf %29, %4 : vector<16x128xf32>
    %197 = arith.subf %196, %26 : vector<16x128xf32>
    %198 = arith.subf %196, %27 : vector<16x128xf32>
    %199 = arith.subf %196, %28 : vector<16x128xf32>
    %200 = arith.subf %196, %30 : vector<16x128xf32>
    %201 = arith.subf %196, %31 : vector<16x128xf32>
    %202 = arith.subf %196, %32 : vector<16x128xf32>
    %203 = arith.subf %196, %33 : vector<16x128xf32>
    %204 = tpu.concatenate %197, %198, %199, %196, %200, %201, %202, %203 in 1 : vector<16x128xf32>, vector<16x128xf32>, vector<16x128xf32>, vector<16x128xf32>, vector<16x128xf32>, vector<16x128xf32>, vector<16x128xf32>, vector<16x128xf32> -> vector<16x1024xf32>
    %cst_39 = arith.constant 0.000000e+00 : f32
    %205 = vector.broadcast %cst_39 : f32 to vector<16x1024xf32>
    %206 = arith.maximumf %204, %205 : vector<16x1024xf32>
    %cst_40 = arith.constant dense<0.000000e+00> : vector<4x1024xf32>
    %207 = tpu.matmul %1, %206, %cst_40 {dimension_numbers = #tpu.dot_dimension_numbers<[1], [0], [0], [1], [0, 0, 1, 1], [], []>} : vector<4x16xf32>, vector<16x1024xf32>, vector<4x1024xf32> -> vector<4x1024xf32>
    %208 = vector.extract_strided_slice %207 {offsets = [0, 384], sizes = [4, 128], strides = [1, 1]} : vector<4x1024xf32> to vector<4x128xf32>
    %209 = arith.mulf %15, %208 : vector<4x128xf32>
    %210 = arith.subf %15, %9 : vector<4x128xf32>
    %211 = vector.extract_strided_slice %207 {offsets = [0, 0], sizes = [4, 128], strides = [1, 1]} : vector<4x1024xf32> to vector<4x128xf32>
    %212 = arith.mulf %210, %211 : vector<4x128xf32>
    %213 = arith.addf %209, %212 : vector<4x128xf32>
    %214 = arith.addf %15, %210 : vector<4x128xf32>
    %215 = arith.subf %15, %11 : vector<4x128xf32>
    %216 = vector.extract_strided_slice %207 {offsets = [0, 128], sizes = [4, 128], strides = [1, 1]} : vector<4x1024xf32> to vector<4x128xf32>
    %217 = arith.mulf %215, %216 : vector<4x128xf32>
    %218 = arith.addf %213, %217 : vector<4x128xf32>
    %219 = arith.addf %214, %215 : vector<4x128xf32>
    %220 = arith.subf %15, %13 : vector<4x128xf32>
    %221 = vector.extract_strided_slice %207 {offsets = [0, 256], sizes = [4, 128], strides = [1, 1]} : vector<4x1024xf32> to vector<4x128xf32>
    %222 = arith.mulf %220, %221 : vector<4x128xf32>
    %223 = arith.addf %218, %222 : vector<4x128xf32>
    %224 = arith.addf %219, %220 : vector<4x128xf32>
    %225 = arith.subf %15, %17 : vector<4x128xf32>
    %226 = vector.extract_strided_slice %207 {offsets = [0, 512], sizes = [4, 128], strides = [1, 1]} : vector<4x1024xf32> to vector<4x128xf32>
    %227 = arith.mulf %225, %226 : vector<4x128xf32>
    %228 = arith.addf %223, %227 : vector<4x128xf32>
    %229 = arith.addf %224, %225 : vector<4x128xf32>
    %230 = arith.subf %15, %19 : vector<4x128xf32>
    %231 = vector.extract_strided_slice %207 {offsets = [0, 640], sizes = [4, 128], strides = [1, 1]} : vector<4x1024xf32> to vector<4x128xf32>
    %232 = arith.mulf %230, %231 : vector<4x128xf32>
    %233 = arith.addf %228, %232 : vector<4x128xf32>
    %234 = arith.addf %229, %230 : vector<4x128xf32>
    %235 = arith.subf %15, %21 : vector<4x128xf32>
    %236 = vector.extract_strided_slice %207 {offsets = [0, 768], sizes = [4, 128], strides = [1, 1]} : vector<4x1024xf32> to vector<4x128xf32>
    %237 = arith.mulf %235, %236 : vector<4x128xf32>
    %238 = arith.addf %233, %237 : vector<4x128xf32>
    %239 = arith.addf %234, %235 : vector<4x128xf32>
    %240 = arith.subf %15, %23 : vector<4x128xf32>
    %241 = vector.extract_strided_slice %207 {offsets = [0, 896], sizes = [4, 128], strides = [1, 1]} : vector<4x1024xf32> to vector<4x128xf32>
    %242 = arith.mulf %240, %241 : vector<4x128xf32>
    %243 = arith.addf %238, %242 : vector<4x128xf32>
    %244 = arith.addf %239, %240 : vector<4x128xf32>
    %245 = arith.mulf %7, %244 : vector<4x128xf32>
    %246 = arith.addf %243, %245 : vector<4x128xf32>
    %c3_41 = arith.constant 3 : index
    %c0_42 = arith.constant 0 : index
    %c0_43 = arith.constant 0 : index
    %247 = vector.load %arg6[%c3_41, %c0_42, %c0_43] : memref<8x4x128xf32, #tpu.memory_space<vmem>>, vector<1x4x128xf32>
    %248 = vector.shape_cast %247 : vector<1x4x128xf32> to vector<4x128xf32>
    %249 = vector.shape_cast %246 : vector<4x128xf32> to vector<1x4x128xf32>
    tpu.vector_store %arg6[%c3_41, %c0_42, %c0_43], %249 {strides = array<i32>} : memref<8x4x128xf32, #tpu.memory_space<vmem>>, vector<1x4x128xf32>,
    %250 = arith.addf %30, %4 : vector<16x128xf32>
    %251 = arith.subf %250, %26 : vector<16x128xf32>
    %252 = arith.subf %250, %27 : vector<16x128xf32>
    %253 = arith.subf %250, %28 : vector<16x128xf32>
    %254 = arith.subf %250, %29 : vector<16x128xf32>
    %255 = arith.subf %250, %31 : vector<16x128xf32>
    %256 = arith.subf %250, %32 : vector<16x128xf32>
    %257 = arith.subf %250, %33 : vector<16x128xf32>
    %258 = tpu.concatenate %251, %252, %253, %254, %250, %255, %256, %257 in 1 : vector<16x128xf32>, vector<16x128xf32>, vector<16x128xf32>, vector<16x128xf32>, vector<16x128xf32>, vector<16x128xf32>, vector<16x128xf32>, vector<16x128xf32> -> vector<16x1024xf32>
    %cst_44 = arith.constant 0.000000e+00 : f32
    %259 = vector.broadcast %cst_44 : f32 to vector<16x1024xf32>
    %260 = arith.maximumf %258, %259 : vector<16x1024xf32>
    %cst_45 = arith.constant dense<0.000000e+00> : vector<4x1024xf32>
    %261 = tpu.matmul %1, %260, %cst_45 {dimension_numbers = #tpu.dot_dimension_numbers<[1], [0], [0], [1], [0, 0, 1, 1], [], []>} : vector<4x16xf32>, vector<16x1024xf32>, vector<4x1024xf32> -> vector<4x1024xf32>
    %262 = vector.extract_strided_slice %261 {offsets = [0, 512], sizes = [4, 128], strides = [1, 1]} : vector<4x1024xf32> to vector<4x128xf32>
    %263 = arith.mulf %17, %262 : vector<4x128xf32>
    %264 = arith.subf %17, %9 : vector<4x128xf32>
    %265 = vector.extract_strided_slice %261 {offsets = [0, 0], sizes = [4, 128], strides = [1, 1]} : vector<4x1024xf32> to vector<4x128xf32>
    %266 = arith.mulf %264, %265 : vector<4x128xf32>
    %267 = arith.addf %263, %266 : vector<4x128xf32>
    %268 = arith.addf %17, %264 : vector<4x128xf32>
    %269 = arith.subf %17, %11 : vector<4x128xf32>
    %270 = vector.extract_strided_slice %261 {offsets = [0, 128], sizes = [4, 128], strides = [1, 1]} : vector<4x1024xf32> to vector<4x128xf32>
    %271 = arith.mulf %269, %270 : vector<4x128xf32>
    %272 = arith.addf %267, %271 : vector<4x128xf32>
    %273 = arith.addf %268, %269 : vector<4x128xf32>
    %274 = arith.subf %17, %13 : vector<4x128xf32>
    %275 = vector.extract_strided_slice %261 {offsets = [0, 256], sizes = [4, 128], strides = [1, 1]} : vector<4x1024xf32> to vector<4x128xf32>
    %276 = arith.mulf %274, %275 : vector<4x128xf32>
    %277 = arith.addf %272, %276 : vector<4x128xf32>
    %278 = arith.addf %273, %274 : vector<4x128xf32>
    %279 = arith.subf %17, %15 : vector<4x128xf32>
    %280 = vector.extract_strided_slice %261 {offsets = [0, 384], sizes = [4, 128], strides = [1, 1]} : vector<4x1024xf32> to vector<4x128xf32>
    %281 = arith.mulf %279, %280 : vector<4x128xf32>
    %282 = arith.addf %277, %281 : vector<4x128xf32>
    %283 = arith.addf %278, %279 : vector<4x128xf32>
    %284 = arith.subf %17, %19 : vector<4x128xf32>
    %285 = vector.extract_strided_slice %261 {offsets = [0, 640], sizes = [4, 128], strides = [1, 1]} : vector<4x1024xf32> to vector<4x128xf32>
    %286 = arith.mulf %284, %285 : vector<4x128xf32>
    %287 = arith.addf %282, %286 : vector<4x128xf32>
    %288 = arith.addf %283, %284 : vector<4x128xf32>
    %289 = arith.subf %17, %21 : vector<4x128xf32>
    %290 = vector.extract_strided_slice %261 {offsets = [0, 768], sizes = [4, 128], strides = [1, 1]} : vector<4x1024xf32> to vector<4x128xf32>
    %291 = arith.mulf %289, %290 : vector<4x128xf32>
    %292 = arith.addf %287, %291 : vector<4x128xf32>
    %293 = arith.addf %288, %289 : vector<4x128xf32>
    %294 = arith.subf %17, %23 : vector<4x128xf32>
    %295 = vector.extract_strided_slice %261 {offsets = [0, 896], sizes = [4, 128], strides = [1, 1]} : vector<4x1024xf32> to vector<4x128xf32>
    %296 = arith.mulf %294, %295 : vector<4x128xf32>
    %297 = arith.addf %292, %296 : vector<4x128xf32>
    %298 = arith.addf %293, %294 : vector<4x128xf32>
    %299 = arith.mulf %7, %298 : vector<4x128xf32>
    %300 = arith.addf %297, %299 : vector<4x128xf32>
    %c4_46 = arith.constant 4 : index
    %c0_47 = arith.constant 0 : index
    %c0_48 = arith.constant 0 : index
    %301 = vector.load %arg6[%c4_46, %c0_47, %c0_48] : memref<8x4x128xf32, #tpu.memory_space<vmem>>, vector<1x4x128xf32>
    %302 = vector.shape_cast %301 : vector<1x4x128xf32> to vector<4x128xf32>
    %303 = vector.shape_cast %300 : vector<4x128xf32> to vector<1x4x128xf32>
    tpu.vector_store %arg6[%c4_46, %c0_47, %c0_48], %303 {strides = array<i32>} : memref<8x4x128xf32, #tpu.memory_space<vmem>>, vector<1x4x128xf32>,
    %304 = arith.addf %31, %4 : vector<16x128xf32>
    %305 = arith.subf %304, %26 : vector<16x128xf32>
    %306 = arith.subf %304, %27 : vector<16x128xf32>
    %307 = arith.subf %304, %28 : vector<16x128xf32>
    %308 = arith.subf %304, %29 : vector<16x128xf32>
    %309 = arith.subf %304, %30 : vector<16x128xf32>
    %310 = arith.subf %304, %32 : vector<16x128xf32>
    %311 = arith.subf %304, %33 : vector<16x128xf32>
    %312 = tpu.concatenate %305, %306, %307, %308, %309, %304, %310, %311 in 1 : vector<16x128xf32>, vector<16x128xf32>, vector<16x128xf32>, vector<16x128xf32>, vector<16x128xf32>, vector<16x128xf32>, vector<16x128xf32>, vector<16x128xf32> -> vector<16x1024xf32>
    %cst_49 = arith.constant 0.000000e+00 : f32
    %313 = vector.broadcast %cst_49 : f32 to vector<16x1024xf32>
    %314 = arith.maximumf %312, %313 : vector<16x1024xf32>
    %cst_50 = arith.constant dense<0.000000e+00> : vector<4x1024xf32>
    %315 = tpu.matmul %1, %314, %cst_50 {dimension_numbers = #tpu.dot_dimension_numbers<[1], [0], [0], [1], [0, 0, 1, 1], [], []>} : vector<4x16xf32>, vector<16x1024xf32>, vector<4x1024xf32> -> vector<4x1024xf32>
    %316 = vector.extract_strided_slice %315 {offsets = [0, 640], sizes = [4, 128], strides = [1, 1]} : vector<4x1024xf32> to vector<4x128xf32>
    %317 = arith.mulf %19, %316 : vector<4x128xf32>
    %318 = arith.subf %19, %9 : vector<4x128xf32>
    %319 = vector.extract_strided_slice %315 {offsets = [0, 0], sizes = [4, 128], strides = [1, 1]} : vector<4x1024xf32> to vector<4x128xf32>
    %320 = arith.mulf %318, %319 : vector<4x128xf32>
    %321 = arith.addf %317, %320 : vector<4x128xf32>
    %322 = arith.addf %19, %318 : vector<4x128xf32>
    %323 = arith.subf %19, %11 : vector<4x128xf32>
    %324 = vector.extract_strided_slice %315 {offsets = [0, 128], sizes = [4, 128], strides = [1, 1]} : vector<4x1024xf32> to vector<4x128xf32>
    %325 = arith.mulf %323, %324 : vector<4x128xf32>
    %326 = arith.addf %321, %325 : vector<4x128xf32>
    %327 = arith.addf %322, %323 : vector<4x128xf32>
    %328 = arith.subf %19, %13 : vector<4x128xf32>
    %329 = vector.extract_strided_slice %315 {offsets = [0, 256], sizes = [4, 128], strides = [1, 1]} : vector<4x1024xf32> to vector<4x128xf32>
    %330 = arith.mulf %328, %329 : vector<4x128xf32>
    %331 = arith.addf %326, %330 : vector<4x128xf32>
    %332 = arith.addf %327, %328 : vector<4x128xf32>
    %333 = arith.subf %19, %15 : vector<4x128xf32>
    %334 = vector.extract_strided_slice %315 {offsets = [0, 384], sizes = [4, 128], strides = [1, 1]} : vector<4x1024xf32> to vector<4x128xf32>
    %335 = arith.mulf %333, %334 : vector<4x128xf32>
    %336 = arith.addf %331, %335 : vector<4x128xf32>
    %337 = arith.addf %332, %333 : vector<4x128xf32>
    %338 = arith.subf %19, %17 : vector<4x128xf32>
    %339 = vector.extract_strided_slice %315 {offsets = [0, 512], sizes = [4, 128], strides = [1, 1]} : vector<4x1024xf32> to vector<4x128xf32>
    %340 = arith.mulf %338, %339 : vector<4x128xf32>
    %341 = arith.addf %336, %340 : vector<4x128xf32>
    %342 = arith.addf %337, %338 : vector<4x128xf32>
    %343 = arith.subf %19, %21 : vector<4x128xf32>
    %344 = vector.extract_strided_slice %315 {offsets = [0, 768], sizes = [4, 128], strides = [1, 1]} : vector<4x1024xf32> to vector<4x128xf32>
    %345 = arith.mulf %343, %344 : vector<4x128xf32>
    %346 = arith.addf %341, %345 : vector<4x128xf32>
    %347 = arith.addf %342, %343 : vector<4x128xf32>
    %348 = arith.subf %19, %23 : vector<4x128xf32>
    %349 = vector.extract_strided_slice %315 {offsets = [0, 896], sizes = [4, 128], strides = [1, 1]} : vector<4x1024xf32> to vector<4x128xf32>
    %350 = arith.mulf %348, %349 : vector<4x128xf32>
    %351 = arith.addf %346, %350 : vector<4x128xf32>
    %352 = arith.addf %347, %348 : vector<4x128xf32>
    %353 = arith.mulf %7, %352 : vector<4x128xf32>
    %354 = arith.addf %351, %353 : vector<4x128xf32>
    %c5_51 = arith.constant 5 : index
    %c0_52 = arith.constant 0 : index
    %c0_53 = arith.constant 0 : index
    %355 = vector.load %arg6[%c5_51, %c0_52, %c0_53] : memref<8x4x128xf32, #tpu.memory_space<vmem>>, vector<1x4x128xf32>
    %356 = vector.shape_cast %355 : vector<1x4x128xf32> to vector<4x128xf32>
    %357 = vector.shape_cast %354 : vector<4x128xf32> to vector<1x4x128xf32>
    tpu.vector_store %arg6[%c5_51, %c0_52, %c0_53], %357 {strides = array<i32>} : memref<8x4x128xf32, #tpu.memory_space<vmem>>, vector<1x4x128xf32>,
    %358 = arith.addf %32, %4 : vector<16x128xf32>
    %359 = arith.subf %358, %26 : vector<16x128xf32>
    %360 = arith.subf %358, %27 : vector<16x128xf32>
    %361 = arith.subf %358, %28 : vector<16x128xf32>
    %362 = arith.subf %358, %29 : vector<16x128xf32>
    %363 = arith.subf %358, %30 : vector<16x128xf32>
    %364 = arith.subf %358, %31 : vector<16x128xf32>
    %365 = arith.subf %358, %33 : vector<16x128xf32>
    %366 = tpu.concatenate %359, %360, %361, %362, %363, %364, %358, %365 in 1 : vector<16x128xf32>, vector<16x128xf32>, vector<16x128xf32>, vector<16x128xf32>, vector<16x128xf32>, vector<16x128xf32>, vector<16x128xf32>, vector<16x128xf32> -> vector<16x1024xf32>
    %cst_54 = arith.constant 0.000000e+00 : f32
    %367 = vector.broadcast %cst_54 : f32 to vector<16x1024xf32>
    %368 = arith.maximumf %366, %367 : vector<16x1024xf32>
    %cst_55 = arith.constant dense<0.000000e+00> : vector<4x1024xf32>
    %369 = tpu.matmul %1, %368, %cst_55 {dimension_numbers = #tpu.dot_dimension_numbers<[1], [0], [0], [1], [0, 0, 1, 1], [], []>} : vector<4x16xf32>, vector<16x1024xf32>, vector<4x1024xf32> -> vector<4x1024xf32>
    %370 = vector.extract_strided_slice %369 {offsets = [0, 768], sizes = [4, 128], strides = [1, 1]} : vector<4x1024xf32> to vector<4x128xf32>
    %371 = arith.mulf %21, %370 : vector<4x128xf32>
    %372 = arith.subf %21, %9 : vector<4x128xf32>
    %373 = vector.extract_strided_slice %369 {offsets = [0, 0], sizes = [4, 128], strides = [1, 1]} : vector<4x1024xf32> to vector<4x128xf32>
    %374 = arith.mulf %372, %373 : vector<4x128xf32>
    %375 = arith.addf %371, %374 : vector<4x128xf32>
    %376 = arith.addf %21, %372 : vector<4x128xf32>
    %377 = arith.subf %21, %11 : vector<4x128xf32>
    %378 = vector.extract_strided_slice %369 {offsets = [0, 128], sizes = [4, 128], strides = [1, 1]} : vector<4x1024xf32> to vector<4x128xf32>
    %379 = arith.mulf %377, %378 : vector<4x128xf32>
    %380 = arith.addf %375, %379 : vector<4x128xf32>
    %381 = arith.addf %376, %377 : vector<4x128xf32>
    %382 = arith.subf %21, %13 : vector<4x128xf32>
    %383 = vector.extract_strided_slice %369 {offsets = [0, 256], sizes = [4, 128], strides = [1, 1]} : vector<4x1024xf32> to vector<4x128xf32>
    %384 = arith.mulf %382, %383 : vector<4x128xf32>
    %385 = arith.addf %380, %384 : vector<4x128xf32>
    %386 = arith.addf %381, %382 : vector<4x128xf32>
    %387 = arith.subf %21, %15 : vector<4x128xf32>
    %388 = vector.extract_strided_slice %369 {offsets = [0, 384], sizes = [4, 128], strides = [1, 1]} : vector<4x1024xf32> to vector<4x128xf32>
    %389 = arith.mulf %387, %388 : vector<4x128xf32>
    %390 = arith.addf %385, %389 : vector<4x128xf32>
    %391 = arith.addf %386, %387 : vector<4x128xf32>
    %392 = arith.subf %21, %17 : vector<4x128xf32>
    %393 = vector.extract_strided_slice %369 {offsets = [0, 512], sizes = [4, 128], strides = [1, 1]} : vector<4x1024xf32> to vector<4x128xf32>
    %394 = arith.mulf %392, %393 : vector<4x128xf32>
    %395 = arith.addf %390, %394 : vector<4x128xf32>
    %396 = arith.addf %391, %392 : vector<4x128xf32>
    %397 = arith.subf %21, %19 : vector<4x128xf32>
    %398 = vector.extract_strided_slice %369 {offsets = [0, 640], sizes = [4, 128], strides = [1, 1]} : vector<4x1024xf32> to vector<4x128xf32>
    %399 = arith.mulf %397, %398 : vector<4x128xf32>
    %400 = arith.addf %395, %399 : vector<4x128xf32>
    %401 = arith.addf %396, %397 : vector<4x128xf32>
    %402 = arith.subf %21, %23 : vector<4x128xf32>
    %403 = vector.extract_strided_slice %369 {offsets = [0, 896], sizes = [4, 128], strides = [1, 1]} : vector<4x1024xf32> to vector<4x128xf32>
    %404 = arith.mulf %402, %403 : vector<4x128xf32>
    %405 = arith.addf %400, %404 : vector<4x128xf32>
    %406 = arith.addf %401, %402 : vector<4x128xf32>
    %407 = arith.mulf %7, %406 : vector<4x128xf32>
    %408 = arith.addf %405, %407 : vector<4x128xf32>
    %c6_56 = arith.constant 6 : index
    %c0_57 = arith.constant 0 : index
    %c0_58 = arith.constant 0 : index
    %409 = vector.load %arg6[%c6_56, %c0_57, %c0_58] : memref<8x4x128xf32, #tpu.memory_space<vmem>>, vector<1x4x128xf32>
    %410 = vector.shape_cast %409 : vector<1x4x128xf32> to vector<4x128xf32>
    %411 = vector.shape_cast %408 : vector<4x128xf32> to vector<1x4x128xf32>
    tpu.vector_store %arg6[%c6_56, %c0_57, %c0_58], %411 {strides = array<i32>} : memref<8x4x128xf32, #tpu.memory_space<vmem>>, vector<1x4x128xf32>,
    %412 = arith.addf %33, %4 : vector<16x128xf32>
    %413 = arith.subf %412, %26 : vector<16x128xf32>
    %414 = arith.subf %412, %27 : vector<16x128xf32>
    %415 = arith.subf %412, %28 : vector<16x128xf32>
    %416 = arith.subf %412, %29 : vector<16x128xf32>
    %417 = arith.subf %412, %30 : vector<16x128xf32>
    %418 = arith.subf %412, %31 : vector<16x128xf32>
    %419 = arith.subf %412, %32 : vector<16x128xf32>
    %420 = tpu.concatenate %413, %414, %415, %416, %417, %418, %419, %412 in 1 : vector<16x128xf32>, vector<16x128xf32>, vector<16x128xf32>, vector<16x128xf32>, vector<16x128xf32>, vector<16x128xf32>, vector<16x128xf32>, vector<16x128xf32> -> vector<16x1024xf32>
    %cst_59 = arith.constant 0.000000e+00 : f32
    %421 = vector.broadcast %cst_59 : f32 to vector<16x1024xf32>
    %422 = arith.maximumf %420, %421 : vector<16x1024xf32>
    %cst_60 = arith.constant dense<0.000000e+00> : vector<4x1024xf32>
    %423 = tpu.matmul %1, %422, %cst_60 {dimension_numbers = #tpu.dot_dimension_numbers<[1], [0], [0], [1], [0, 0, 1, 1], [], []>} : vector<4x16xf32>, vector<16x1024xf32>, vector<4x1024xf32> -> vector<4x1024xf32>
    %424 = vector.extract_strided_slice %423 {offsets = [0, 896], sizes = [4, 128], strides = [1, 1]} : vector<4x1024xf32> to vector<4x128xf32>
    %425 = arith.mulf %23, %424 : vector<4x128xf32>
    %426 = arith.subf %23, %9 : vector<4x128xf32>
    %427 = vector.extract_strided_slice %423 {offsets = [0, 0], sizes = [4, 128], strides = [1, 1]} : vector<4x1024xf32> to vector<4x128xf32>
    %428 = arith.mulf %426, %427 : vector<4x128xf32>
    %429 = arith.addf %425, %428 : vector<4x128xf32>
    %430 = arith.addf %23, %426 : vector<4x128xf32>
    %431 = arith.subf %23, %11 : vector<4x128xf32>
    %432 = vector.extract_strided_slice %423 {offsets = [0, 128], sizes = [4, 128], strides = [1, 1]} : vector<4x1024xf32> to vector<4x128xf32>
    %433 = arith.mulf %431, %432 : vector<4x128xf32>
    %434 = arith.addf %429, %433 : vector<4x128xf32>
    %435 = arith.addf %430, %431 : vector<4x128xf32>
    %436 = arith.subf %23, %13 : vector<4x128xf32>
    %437 = vector.extract_strided_slice %423 {offsets = [0, 256], sizes = [4, 128], strides = [1, 1]} : vector<4x1024xf32> to vector<4x128xf32>
    %438 = arith.mulf %436, %437 : vector<4x128xf32>
    %439 = arith.addf %434, %438 : vector<4x128xf32>
    %440 = arith.addf %435, %436 : vector<4x128xf32>
    %441 = arith.subf %23, %15 : vector<4x128xf32>
    %442 = vector.extract_strided_slice %423 {offsets = [0, 384], sizes = [4, 128], strides = [1, 1]} : vector<4x1024xf32> to vector<4x128xf32>
    %443 = arith.mulf %441, %442 : vector<4x128xf32>
    %444 = arith.addf %439, %443 : vector<4x128xf32>
    %445 = arith.addf %440, %441 : vector<4x128xf32>
    %446 = arith.subf %23, %17 : vector<4x128xf32>
    %447 = vector.extract_strided_slice %423 {offsets = [0, 512], sizes = [4, 128], strides = [1, 1]} : vector<4x1024xf32> to vector<4x128xf32>
    %448 = arith.mulf %446, %447 : vector<4x128xf32>
    %449 = arith.addf %444, %448 : vector<4x128xf32>
    %450 = arith.addf %445, %446 : vector<4x128xf32>
    %451 = arith.subf %23, %19 : vector<4x128xf32>
    %452 = vector.extract_strided_slice %423 {offsets = [0, 640], sizes = [4, 128], strides = [1, 1]} : vector<4x1024xf32> to vector<4x128xf32>
    %453 = arith.mulf %451, %452 : vector<4x128xf32>
    %454 = arith.addf %449, %453 : vector<4x128xf32>
    %455 = arith.addf %450, %451 : vector<4x128xf32>
    %456 = arith.subf %23, %21 : vector<4x128xf32>
    %457 = vector.extract_strided_slice %423 {offsets = [0, 768], sizes = [4, 128], strides = [1, 1]} : vector<4x1024xf32> to vector<4x128xf32>
    %458 = arith.mulf %456, %457 : vector<4x128xf32>
    %459 = arith.addf %454, %458 : vector<4x128xf32>
    %460 = arith.addf %455, %456 : vector<4x128xf32>
    %461 = arith.mulf %7, %460 : vector<4x128xf32>
    %462 = arith.addf %459, %461 : vector<4x128xf32>
    %c7_61 = arith.constant 7 : index
    %c0_62 = arith.constant 0 : index
    %c0_63 = arith.constant 0 : index
    %463 = vector.load %arg6[%c7_61, %c0_62, %c0_63] : memref<8x4x128xf32, #tpu.memory_space<vmem>>, vector<1x4x128xf32>
    %464 = vector.shape_cast %463 : vector<1x4x128xf32> to vector<4x128xf32>
    %465 = vector.shape_cast %462 : vector<4x128xf32> to vector<1x4x128xf32>
    tpu.vector_store %arg6[%c7_61, %c0_62, %c0_63], %465 {strides = array<i32>} : memref<8x4x128xf32, #tpu.memory_space<vmem>>, vector<1x4x128xf32>,
    return
  }
  func.func @transform_0(%arg0: i32) -> (i32, i32, i32) {
    %c0_i32 = arith.constant 0 : i32
    %c0_i32_0 = arith.constant 0 : i32
    %c0_i32_1 = arith.constant 0 : i32
    return %c0_i32, %c0_i32_0, %arg0 : i32, i32, i32
  }
  func.func @transform_1(%arg0: i32) -> (i32, i32) {
    %c0_i32 = arith.constant 0 : i32
    %c0_i32_0 = arith.constant 0 : i32
    %c0_i32_1 = arith.constant 0 : i32
    return %c0_i32, %c0_i32_0 : i32, i32
  }
  func.func @transform_2(%arg0: i32) -> (i32, i32) {
    %c0_i32 = arith.constant 0 : i32
    %c0_i32_0 = arith.constant 0 : i32
    %c0_i32_1 = arith.constant 0 : i32
    return %c0_i32, %c0_i32_0 : i32, i32
  }
  func.func @transform_3(%arg0: i32) -> (i32, i32) {
    %c0_i32 = arith.constant 0 : i32
    %c0_i32_0 = arith.constant 0 : i32
    %c0_i32_1 = arith.constant 0 : i32
    return %c0_i32, %c0_i32_0 : i32, i32
  }
  func.func @transform_4(%arg0: i32) -> (i32, i32) {
    %c0_i32 = arith.constant 0 : i32
    %c0_i32_0 = arith.constant 0 : i32
    %c0_i32_1 = arith.constant 0 : i32
    return %c0_i32, %c0_i32_0 : i32, i32
  }
  func.func @transform_5(%arg0: i32) -> (i32, i32, i32) {
    %c0_i32 = arith.constant 0 : i32
    %c0_i32_0 = arith.constant 0 : i32
    %c0_i32_1 = arith.constant 0 : i32
    return %c0_i32, %c0_i32_0, %arg0 : i32, i32, i32
  }
}

</mosaic_0001>

<bundles_post_ra>
// kernel: tpu_custom_call.1
= control target key start
LH: loop header
LB: loop body
LE: loop exit
PB: predicated region body
PF: predicated region fallthrough
CT: control target
= control target key end

     0   :  { %vm64_vm0 = vcmask 1043456   ;;  %vm57_vm1 = vcmask 31744   ;;  %v3430_v5 = vmov 0.0   ;;  %s4220_s0 = inlined_call_operand.vmem [shape: f32[8,4,128], index: 0, kind: input, shape index: {}]   ;;  %s4221_s1 = inlined_call_operand.vmem [shape: f32[16,4], index: 1, kind: input, shape index: {}]   ;;  %s4222_s2 = inlined_call_operand.vmem [shape: f32[16,1], index: 2, kind: input, shape index: {}]   ;;  %s4223_s3 = inlined_call_operand.vmem [shape: f32[4,16], index: 3, kind: input, shape index: {}]   ;;  %s4224_s4 = inlined_call_operand.vmem [shape: f32[4,1], index: 4, kind: input, shape index: {}]   ;;  %s4225_s5 = inlined_call_operand.hbm [shape: f32[8,4,128], index: 5, kind: output, shape index: {}]  }
   0x1   :  { %v3208_v0 = vld [vmem:[%s4220_s0 + $0x4] sm:$0xf]  ;;  %v3210_v1 = vld [vmem:[%s4220_s0 + $0xc] sm:$0xf]  ;;  %v3476_v2 = vld [vmem:[%s4220_s0] sm:$0xf]  ;;  %153 = vmatprep.mubr.f32.mxu0 %v3430_v5  ;;  %230 = vmatprep.mubr.f32.mxu1 %v3430_v5 }
   0x2   :  { %3215 = vmatprep.subr.msk.mxu0 %vm64_vm0, %v3208_v0  ;;  %3219 = vmatprep.subr.msk.mxu1 %vm64_vm0, %v3210_v1  ;;  %v3481_v3 = vld [vmem:[%s4220_s0 + $0x8] sm:$0xf]  ;;  %v21_v4 = vld [vmem:[%s4221_s1] sm:$0xff]  ;;  %v3214_v6 = vld [vmem:[%s4220_s0 + $0x1c] sm:$0xf] }
   0x3   :  { %3216 = vmatpush1.msk.msra.mxu0 %vm64_vm0, %v3476_v2  ;;  %3220 = vmatpush1.msk.msra.mxu1 %vm64_vm0, %v3481_v3  ;;  %v3213_v7 = vld [vmem:[%s4220_s0 + $0x18] sm:$0xf]  ;;  %v3503_v8 = vld [vmem:[%s4220_s0 + $0x14] sm:$0xf] }
   0x4   :  { %3217 = vmatmul.mubr.msk.f32.vlgmr.msra.gmra.mrb[0].mxu0 %vm57_vm1, %v21_v4  ;;  %3221 = vmatmul.mubr.msk.f32.vlgmr.msra.gmra.mrb[0].mxu1 %vm57_vm1, %v21_v4 }
   0x5   :  { %10 = vsyncpa [#allocation3], 0  ;;  %3227 = vmatprep.subr.msk.mxu1 %vm64_vm0, %v3214_v6  ;;  %159 = vmatprep.mubr.f32.mxu0 %v3430_v5  ;;  %v22_v9 = vld [vmem:[%s4221_s1 + $0x8] sm:$0xff]  ;;  %v3515_v10 = vld [vmem:[%s4220_s0 + $0x10] sm:$0xf]  ;;  %v3431_v11 = vmov 0  }
   0x6   :  { %3228 = vmatpush1.msk.msra.mxu1 %vm64_vm0, %v3213_v7  ;;  %236 = vmatprep.mubr.f32.mxu1 %v3430_v5  ;;  %v24_v12 = vld [vmem:[%s4222_s2] sm:$0xff]  ;;  %v25_v13 = vld [vmem:[%s4222_s2 + $0x8] sm:$0xff]  ;;  %vm429_vm2 = vcmask 130048  }
   0x7   :  { %3223 = vmatprep.subr.msk.mxu0 %vm64_vm0, %v3503_v8  ;;  %3396 = vset.pattern.permute.xlu0 %v3431_v11  ;;  %v36_v14 = vld [vmem:[%s4224_s4] sm:$0xf] }
   0x8   :  { %3218 = vmatmul.mubr.msk.f32.gmra.mrb[2].mxu0 %vm57_vm1, %v22_v9  ;;  %3222 = vmatmul.mubr.msk.f32.gmra.mrb[2].mxu1 %vm57_vm1, %v22_v9 }
   0x9   :  { %3224 = vmatpush1.msk.msra.mxu0 %vm64_vm0, %v3515_v10  ;;  %307 = vmatprep.mubr.f32.mxu0 %v3430_v5 }
   0xa   :  { %384 = vmatprep.mubr.f32.mxu1 %v3430_v5  ;;  %28 = vperm.xlu0 %3396, %v24_v12  }
   0xb   :  { %3397 = vset.pattern.permute.xlu1 %v3431_v11 }
   0xc   :  { %3225 = vmatmul.mubr.msk.f32.vlgmr.msra.gmra.mrb[4].mxu0 %vm57_vm1, %v21_v4  ;;  %3229 = vmatmul.mubr.msk.f32.vlgmr.msra.gmra.mrb[4].mxu1 %vm57_vm1, %v21_v4 }
   0xd   :  { %313 = vmatprep.mubr.f32.mxu0 %v3430_v5  ;;  %390 = vmatprep.mubr.f32.mxu1 %v3430_v5 }
   0xe   :  { %33 = vperm.xlu0 %3396, %v25_v13   ;;  %39 = vperm.xlu1 %3397, %v36_v14  }
  0x10   :  { %3226 = vmatmul.mubr.msk.f32.gmra.mrb[6].mxu0 %vm57_vm1, %v22_v9  ;;  %3230 = vmatmul.mubr.msk.f32.gmra.mrb[6].mxu1 %vm57_vm1, %v22_v9 }
  0x11   :  { %497 = vmatprep.mubr.f32.mxu0 %v3430_v5  ;;  %568 = vmatprep.mubr.f32.mxu1 %v3430_v5 }
  0x89   :  { %v29_v15 = vpop.permute.xlu0 %28 }
  0x8d   :  { %v3553_v21 = vpop.permute.xlu0 %33 }
  0xd7   :  { %v3542_v16 = vpop.f32.mrb[0].mxu0  ;;  %v3544_v17 = vpop.f32.mrb[0].mxu1 }
  0xd8   :  { %v3547_v18 = vadd.f32 %v3542_v16, %v29_v15  ;;  %v3549_v19 = vpop.f32.mrb[1].mxu0  ;;  %v3551_v20 = vpop.f32.mrb[1].mxu1  ;;  %v3556_v22 = vadd.f32 %v3544_v17, %v29_v15 }
  0xd9   :  { %v3559_v23 = vadd.f32 %v3549_v19, %v29_v15  ;;  %v3562_v24 = vadd.f32 %v3551_v20, %v29_v15 }
  0xda   :  { %v399_v25 = vsub.f32 %v3547_v18, %v3549_v19  ;;  %v403_v26 = vsub.f32 %v3547_v18, %v3551_v20  ;;  %v413_v27 = vmax.f32 %v3547_v18, 0.0  ;;  %v401_v28 = vsub.f32 %v3547_v18, %v3544_v17 }
  0xdb   :  { %v3571_v29 = vpop.f32.mrb[2].mxu0  ;;  %v3573_v30 = vpop.f32.mrb[2].mxu1  ;;  %v766_v31 = vmax.f32 %v3559_v23, 0.0  ;;  %v755_v32 = vsub.f32 %v3559_v23, %v3551_v20  ;;  %v751_v33 = vsub.f32 %v3559_v23, %v3542_v16  ;;  %v753_v34 = vsub.f32 %v3559_v23, %v3544_v17 }
  0xdc   :  { %v3584_v35 = vadd.f32 %v3571_v29, %v3553_v21  ;;  %v3588_v36 = vadd.f32 %v3573_v30, %v3553_v21  ;;  %v3590_v37 = vpop.f32.mrb[3].mxu0  ;;  %v3592_v38 = vpop.f32.mrb[3].mxu1  ;;  %v414_v39 = vmax.f32 %v399_v25, 0.0  ;;  %v416_v40 = vmax.f32 %v403_v26, 0.0 }
  0xdd   :  { %v3596_v41 = vadd.f32 %v3590_v37, %v3553_v21  ;;  %v3600_v42 = vadd.f32 %v3592_v38, %v3553_v21  ;;  %v415_v43 = vmax.f32 %v401_v28, 0.0  ;;  %v3602_v44 = vmax.f32 %v755_v32, 0.0 }
  0xde   :  { %v400_v45 = vsub.f32 %v3584_v35, %v3590_v37  ;;  %v404_v46 = vsub.f32 %v3584_v35, %v3592_v38  ;;  %v421_v47 = vmax.f32 %v3584_v35, 0.0  ;;  %v402_v48 = vsub.f32 %v3584_v35, %v3573_v30 }
  0xdf   :  { %v3611_v49 = vpop.f32.mrb[4].mxu0  ;;  %v3613_v50 = vpop.f32.mrb[4].mxu1  ;;  %v774_v51 = vmax.f32 %v3596_v41, 0.0  ;;  %v756_v52 = vsub.f32 %v3596_v41, %v3592_v38  ;;  %v752_v53 = vsub.f32 %v3596_v41, %v3571_v29  ;;  %v3620_v54 = vmax.f32 %v751_v33, 0.0 }
  0xe0   :  { %v3623_v55 = vadd.f32 %v3611_v49, %v29_v15  ;;  %v3626_v56 = vadd.f32 %v3613_v50, %v29_v15  ;;  %v3628_v57 = vpop.f32.mrb[5].mxu0  ;;  %v3630_v58 = vpop.f32.mrb[5].mxu1  ;;  %v422_v59 = vmax.f32 %v400_v45, 0.0  ;;  %v424_v60 = vmax.f32 %v404_v46, 0.0 }
  0xe1   :  { %v3633_v61 = vadd.f32 %v3628_v57, %v29_v15  ;;  %v3636_v62 = vadd.f32 %v3630_v58, %v29_v15  ;;  %v3265_v63 = vpack.c.bf16 %v421_v47, %v413_v27  ;;  %v423_v0 = vmax.f32 %v402_v48, 0.0 }
  0xe2   :  { %v3263_v1 = vpack.c.bf16 %v422_v59, %v414_v39  ;;  %v3267_v4 = vpack.c.bf16 %v424_v60, %v416_v40  ;;  %v407_v6 = vsub.f32 %v3547_v18, %v3628_v57  ;;  %v411_v7 = vsub.f32 %v3547_v18, %v3630_v58  ;;  %v3673_v39 = vld [vmem:[%s4223_s3] sm:$0xf] }
  0xe3   :  { %v3642_v9 = vpop.f32.mrb[6].mxu0  ;;  %v3644_v11 = vpop.f32.mrb[6].mxu1  ;;  %v3269_v12 = vpack.c.bf16 %v423_v0, %v415_v43  ;;  %v405_v13 = vsub.f32 %v3547_v18, %v3611_v49  ;;  %v409_v14 = vsub.f32 %v3547_v18, %v3613_v50  ;;  %v3279_v15 = vpack.c.bf16 %v774_v51, %v766_v31 }
  0xe4   :  { %v3652_v25 = vadd.f32 %v3642_v9, %v3553_v21  ;;  %v3656_v26 = vadd.f32 %v3644_v11, %v3553_v21  ;;  %v3658_v27 = vpop.f32.mrb[7].mxu0  ;;  %v3660_v28 = vpop.f32.mrb[7].mxu1  ;;  %3264 = vmatprep.subr.bf16.mxu0 %v3263_v1  ;;  %3268 = vmatprep.subr.bf16.mxu1 %v3267_v4  ;;  %v418_v32 = vmax.f32 %v407_v6, 0.0  ;;  %v420_v33 = vmax.f32 %v411_v7, 0.0 }
  0xe5   :  { %v3664_v18 = vadd.f32 %v3658_v27, %v3553_v21  ;;  %v3668_v31 = vadd.f32 %v3660_v28, %v3553_v21  ;;  %3266 = vmatpush1.bf16.msra.mxu0 %v3265_v63  ;;  %3270 = vmatpush1.bf16.msra.mxu1 %v3269_v12  ;;  %v408_v40 = vsub.f32 %v3584_v35, %v3658_v27  ;;  %v417_v43 = vmax.f32 %v405_v13, 0.0 }
  0xe6   :  { %v412_v45 = vsub.f32 %v3584_v35, %v3660_v28  ;;  %v406_v46 = vsub.f32 %v3584_v35, %v3642_v9  ;;  %v410_v21 = vsub.f32 %v3584_v35, %v3644_v11  ;;  %v419_v47 = vmax.f32 %v409_v14, 0.0 }
  0xe7   :  { %v426_v48 = vmax.f32 %v408_v40, 0.0  ;;  %v776_v51 = vmax.f32 %v756_v52, 0.0  ;;  %v773_v59 = vmax.f32 %v752_v53, 0.0  ;;  %v754_v60 = vsub.f32 %v3596_v41, %v3573_v30 }
  0xe8   :  { %3231 = vmatmul.mubr.msk.f32.vlgmr.msra.gmra.mrb[8].mxu0 %vm429_vm2, %v3673_v39  ;;  %3232 = vmatmul.mubr.msk.f32.vlgmr.msra.gmra.mrb[8].mxu1 %vm429_vm2, %v3673_v39  ;;  %v428_v63 = vmax.f32 %v412_v45, 0.0  ;;  %v425_v0 = vmax.f32 %v406_v46, 0.0  ;;  %v427_v1 = vmax.f32 %v410_v21, 0.0  ;;  %v767_v35 = vmax.f32 %v753_v34, 0.0 }
  0xe9   :  { %v3271_v4 = vpack.c.bf16 %v426_v48, %v418_v32  ;;  %v3283_v52 = vpack.c.bf16 %v776_v51, %v3602_v44  ;;  %639 = vmatprep.mubr.f32.mxu0 %v3430_v5  ;;  %710 = vmatprep.mubr.f32.mxu1 %v3430_v5  ;;  %v3281_v53 = vpack.c.bf16 %v773_v59, %v3620_v54  ;;  %v775_v6 = vmax.f32 %v754_v60, 0.0 }
  0xea   :  { %v3275_v7 = vpack.c.bf16 %v428_v63, %v420_v33  ;;  %v3273_v12 = vpack.c.bf16 %v425_v0, %v417_v43  ;;  %v3277_v13 = vpack.c.bf16 %v427_v1, %v419_v47  ;;  %v759_v14 = vsub.f32 %v3559_v23, %v3628_v57 }
  0xeb   :  { %3272 = vmatprep.subr.bf16.mxu0 %v3271_v4  ;;  %v3285_v40 = vpack.c.bf16 %v775_v6, %v767_v35  ;;  %v760_v34 = vsub.f32 %v3596_v41, %v3658_v27  ;;  %v763_v44 = vsub.f32 %v3559_v23, %v3630_v58  ;;  %v764_v32 = vsub.f32 %v3596_v41, %v3660_v28 }
  0xec   :  { %3276 = vmatprep.subr.bf16.mxu1 %v3275_v7  ;;  %3274 = vmatpush1.bf16.msra.mxu0 %v3273_v12  ;;  %v770_v54 = vmax.f32 %v759_v14, 0.0  ;;  %v757_v33 = vsub.f32 %v3559_v23, %v3611_v49  ;;  %v758_v43 = vsub.f32 %v3596_v41, %v3642_v9  ;;  %v761_v45 = vsub.f32 %v3559_v23, %v3613_v50 }
  0xed   :  { %3278 = vmatpush1.bf16.msra.mxu1 %v3277_v13  ;;  %3280 = vmatprep.subr.bf16.mxu0 %v3279_v15  ;;  %v778_v46 = vmax.f32 %v760_v34, 0.0  ;;  %v772_v21 = vmax.f32 %v763_v44, 0.0  ;;  %v780_v47 = vmax.f32 %v764_v32, 0.0  ;;  %v762_v48 = vsub.f32 %v3596_v41, %v3644_v11 }
  0xee   :  { %3284 = vmatprep.subr.bf16.mxu1 %v3283_v52  ;;  %v769_v51 = vmax.f32 %v757_v33, 0.0  ;;  %v777_v59 = vmax.f32 %v758_v43, 0.0  ;;  %v771_v60 = vmax.f32 %v761_v45, 0.0  ;;  %v1102_v63 = vsub.f32 %v3556_v22, %v3549_v19 }
  0xef   :  { %3233 = vmatmul.mubr.msk.f32.vlgmr.msra.gmra.mrb[10].mxu0 %vm429_vm2, %v3673_v39  ;;  %v3287_v0 = vpack.c.bf16 %v778_v46, %v770_v54  ;;  %v3291_v23 = vpack.c.bf16 %v780_v47, %v772_v21  ;;  %v779_v1 = vmax.f32 %v762_v48, 0.0  ;;  %v1103_v15 = vsub.f32 %v3588_v36, %v3590_v37 }
  0xf0   :  { %3234 = vmatmul.mubr.msk.f32.vlgmr.msra.gmra.mrb[10].mxu1 %vm429_vm2, %v3673_v39  ;;  %3282 = vmatpush1.bf16.msra.mxu0 %v3281_v53  ;;  %v3289_v41 = vpack.c.bf16 %v777_v59, %v769_v51  ;;  %v1115_v35 = vmax.f32 %v1102_v63, 0.0  ;;  %v1104_v4 = vsub.f32 %v3556_v22, %v3551_v20  ;;  %v1105_v52 = vsub.f32 %v3588_v36, %v3592_v38 }
  0xf1   :  { %3286 = vmatpush1.bf16.msra.mxu1 %v3285_v40  ;;  %3288 = vmatprep.subr.bf16.mxu0 %v3287_v0  ;;  %v3293_v6 = vpack.c.bf16 %v779_v1, %v771_v60  ;;  %v1123_v7 = vmax.f32 %v1103_v15, 0.0  ;;  %v1100_v12 = vsub.f32 %v3556_v22, %v3542_v16  ;;  %v1101_v13 = vsub.f32 %v3588_v36, %v3571_v29 }
  0xf2   :  { %3292 = vmatprep.subr.bf16.mxu1 %v3291_v23  ;;  %845 = vmatprep.mubr.f32.mxu0 %v3430_v5  ;;  %v1117_v53 = vmax.f32 %v1104_v4, 0.0  ;;  %v1125_v14 = vmax.f32 %v1105_v52, 0.0  ;;  %v1116_v34 = vmax.f32 %v3556_v22, 0.0  ;;  %v1124_v44 = vmax.f32 %v3588_v36, 0.0 }
  0xf3   :  { %916 = vmatprep.mubr.f32.mxu1 %v3430_v5  ;;  %3235 = vmatmul.mubr.msk.f32.vlgmr.msra.gmra.mrb[12].mxu0 %vm429_vm2, %v3673_v39  ;;  %v3295_v40 = vpack.c.bf16 %v1123_v7, %v1115_v35  ;;  %v1114_v32 = vmax.f32 %v1100_v12, 0.0  ;;  %v1122_v54 = vmax.f32 %v1101_v13, 0.0  ;;  %v1108_v33 = vsub.f32 %v3556_v22, %v3628_v57 }
  0xf4   :  { %3236 = vmatmul.mubr.msk.f32.vlgmr.msra.gmra.mrb[12].mxu1 %vm429_vm2, %v3673_v39  ;;  %3290 = vmatpush1.bf16.msra.mxu0 %v3289_v41  ;;  %v3299_v43 = vpack.c.bf16 %v1125_v14, %v1117_v53  ;;  %v3301_v45 = vpack.c.bf16 %v1124_v44, %v1116_v34  ;;  %v1109_v46 = vsub.f32 %v3588_v36, %v3658_v27  ;;  %v1466_v21 = vmax.f32 %v3562_v24, 0.0 }
  0xf5   :  { %3294 = vmatpush1.bf16.msra.mxu1 %v3293_v6  ;;  %3296 = vmatprep.subr.bf16.mxu0 %v3295_v40  ;;  %v3297_v47 = vpack.c.bf16 %v1122_v54, %v1114_v32  ;;  %v1119_v48 = vmax.f32 %v1108_v33, 0.0  ;;  %v1112_v51 = vsub.f32 %v3556_v22, %v3630_v58  ;;  %v1113_v59 = vsub.f32 %v3588_v36, %v3660_v28 }
  0xf6   :  { %3300 = vmatprep.subr.bf16.mxu1 %v3299_v43  ;;  %987 = vmatprep.mubr.f32.mxu0 %v3430_v5  ;;  %v1127_v60 = vmax.f32 %v1109_v46, 0.0  ;;  %v1106_v63 = vsub.f32 %v3556_v22, %v3611_v49  ;;  %v1107_v0 = vsub.f32 %v3588_v36, %v3642_v9  ;;  %v1110_v23 = vsub.f32 %v3556_v22, %v3613_v50 }
  0xf7   :  { %1058 = vmatprep.mubr.f32.mxu1 %v3430_v5  ;;  %3237 = vmatmul.mubr.msk.f32.vlgmr.msra.gmra.mrb[14].mxu0 %vm429_vm2, %v3673_v39  ;;  %v1121_v1 = vmax.f32 %v1112_v51, 0.0  ;;  %v1129_v15 = vmax.f32 %v1113_v59, 0.0  ;;  %v1111_v41 = vsub.f32 %v3588_v36, %v3644_v11  ;;  %v1451_v35 = vsub.f32 %v3562_v24, %v3549_v19 }
  0xf8   :  { %3238 = vmatmul.mubr.msk.f32.vlgmr.msra.gmra.mrb[14].mxu1 %vm429_vm2, %v3673_v39  ;;  %3298 = vmatpush1.bf16.msra.mxu0 %v3297_v47  ;;  %v3303_v4 = vpack.c.bf16 %v1127_v60, %v1119_v48  ;;  %v1118_v52 = vmax.f32 %v1106_v63, 0.0  ;;  %v1126_v22 = vmax.f32 %v1107_v0, 0.0  ;;  %v1120_v6 = vmax.f32 %v1110_v23, 0.0 }
  0xf9   :  { %3302 = vmatpush1.bf16.msra.mxu1 %v3301_v45  ;;  %v3307_v7 = vpack.c.bf16 %v1129_v15, %v1121_v1  ;;  %1194 = vmatprep.mubr.f32.mxu0 %v3430_v5  ;;  %v1128_v12 = vmax.f32 %v1111_v41, 0.0  ;;  %v1452_v13 = vsub.f32 %v3600_v42, %v3590_v37  ;;  %v1464_v36 = vmax.f32 %v1451_v35, 0.0 }
  0xfa   :  { %3304 = vmatprep.subr.bf16.mxu0 %v3303_v4  ;;  %1265 = vmatprep.mubr.f32.mxu1 %v3430_v5  ;;  %v3305_v53 = vpack.c.bf16 %v1126_v22, %v1118_v52  ;;  %v1474_v14 = vmax.f32 %v3600_v42, 0.0  ;;  %v1449_v34 = vsub.f32 %v3562_v24, %v3542_v16  ;;  %v1450_v44 = vsub.f32 %v3600_v42, %v3571_v29 }
  0xfb   :  { %3308 = vmatprep.subr.bf16.mxu1 %v3307_v7  ;;  %3239 = vmatmul.mubr.msk.f32.vlgmr.msra.gmra.mrb[16].mxu0 %vm429_vm2, %v3673_v39  ;;  %v3309_v40 = vpack.c.bf16 %v1128_v12, %v1120_v6  ;;  %v1472_v32 = vmax.f32 %v1452_v13, 0.0  ;;  %v1453_v54 = vsub.f32 %v3562_v24, %v3544_v17  ;;  %v1454_v33 = vsub.f32 %v3600_v42, %v3573_v30 }
  0xfc   :  { %3240 = vmatmul.mubr.msk.f32.vlgmr.msra.gmra.mrb[16].mxu1 %vm429_vm2, %v3673_v39  ;;  %3306 = vmatpush1.bf16.msra.mxu0 %v3305_v53  ;;  %v3315_v43 = vpack.c.bf16 %v1474_v14, %v1466_v21  ;;  %v1463_v45 = vmax.f32 %v1449_v34, 0.0  ;;  %v1471_v46 = vmax.f32 %v1450_v44, 0.0  ;;  %v1457_v47 = vsub.f32 %v3562_v24, %v3628_v57 }
  0xfd   :  { %3310 = vmatpush1.bf16.msra.mxu1 %v3309_v40  ;;  %v3311_v48 = vpack.c.bf16 %v1472_v32, %v1464_v36  ;;  %1336 = vmatprep.mubr.f32.mxu0 %v3430_v5  ;;  %v1465_v51 = vmax.f32 %v1453_v54, 0.0  ;;  %v1473_v59 = vmax.f32 %v1454_v33, 0.0  ;;  %v1458_v60 = vsub.f32 %v3600_v42, %v3658_v27 }
  0xfe   :  { %3316 = vmatprep.subr.bf16.mxu1 %v3315_v43  ;;  %1407 = vmatprep.mubr.f32.mxu1 %v3430_v5  ;;  %v3313_v63 = vpack.c.bf16 %v1471_v46, %v1463_v45  ;;  %v1468_v0 = vmax.f32 %v1457_v47, 0.0  ;;  %v1461_v21 = vsub.f32 %v3562_v24, %v3630_v58  ;;  %v1462_v23 = vsub.f32 %v3600_v42, %v3660_v28 }
  0xff   :  { %3312 = vmatprep.subr.bf16.mxu0 %v3311_v48  ;;  %3241 = vmatmul.mubr.msk.f32.vlgmr.msra.gmra.mrb[18].mxu0 %vm429_vm2, %v3673_v39  ;;  %v3317_v1 = vpack.c.bf16 %v1473_v59, %v1465_v51  ;;  %v1476_v15 = vmax.f32 %v1458_v60, 0.0  ;;  %v1455_v41 = vsub.f32 %v3562_v24, %v3611_v49  ;;  %v1456_v35 = vsub.f32 %v3600_v42, %v3642_v9 }
 0x100   :  { %3242 = vmatmul.mubr.msk.f32.vlgmr.msra.gmra.mrb[18].mxu1 %vm429_vm2, %v3673_v39  ;;  %3314 = vmatpush1.bf16.msra.mxu0 %v3313_v63  ;;  %v1470_v4 = vmax.f32 %v1461_v21, 0.0  ;;  %v1478_v52 = vmax.f32 %v1462_v23, 0.0  ;;  %v1459_v22 = vsub.f32 %v3562_v24, %v3613_v50  ;;  %v1460_v6 = vsub.f32 %v3600_v42, %v3644_v11 }
 0x101   :  { %3318 = vmatpush1.bf16.msra.mxu1 %v3317_v1  ;;  %v3319_v7 = vpack.c.bf16 %v1476_v15, %v1468_v0  ;;  %1543 = vmatprep.mubr.f32.mxu0 %v3430_v5  ;;  %v1467_v12 = vmax.f32 %v1455_v41, 0.0  ;;  %v1475_v13 = vmax.f32 %v1456_v35, 0.0  ;;  %v1800_v36 = vsub.f32 %v3623_v55, %v3549_v19 }
 0x102   :  { %v3323_v53 = vpack.c.bf16 %v1478_v52, %v1470_v4  ;;  %1614 = vmatprep.mubr.f32.mxu1 %v3430_v5  ;;  %v1469_v14 = vmax.f32 %v1459_v22, 0.0  ;;  %v1477_v34 = vmax.f32 %v1460_v6, 0.0  ;;  %v1801_v24 = vsub.f32 %v3652_v25, %v3590_v37 }
 0x103   :  { %3320 = vmatprep.subr.bf16.mxu0 %v3319_v7  ;;  %3243 = vmatmul.mubr.msk.f32.vlgmr.msra.gmra.mrb[20].mxu0 %vm429_vm2, %v3673_v39  ;;  %v3321_v42 = vpack.c.bf16 %v1475_v13, %v1467_v12  ;;  %v1813_v44 = vmax.f32 %v1800_v36, 0.0  ;;  %v1804_v40 = vsub.f32 %v3623_v55, %v3551_v20  ;;  %v1805_v32 = vsub.f32 %v3652_v25, %v3592_v38 }
 0x104   :  { %3324 = vmatprep.subr.bf16.mxu1 %v3323_v53  ;;  %3244 = vmatmul.mubr.msk.f32.vlgmr.msra.gmra.mrb[20].mxu1 %vm429_vm2, %v3673_v39  ;;  %v3325_v54 = vpack.c.bf16 %v1477_v34, %v1469_v14  ;;  %v1821_v33 = vmax.f32 %v1801_v24, 0.0  ;;  %v1798_v43 = vsub.f32 %v3623_v55, %v3542_v16  ;;  %v1799_v45 = vsub.f32 %v3652_v25, %v3571_v29 }
 0x105   :  { %3322 = vmatpush1.bf16.msra.mxu0 %v3321_v42  ;;  %v1815_v46 = vmax.f32 %v1804_v40, 0.0  ;;  %v1823_v47 = vmax.f32 %v1805_v32, 0.0  ;;  %1685 = vmatprep.mubr.f32.mxu0 %v3430_v5  ;;  %v1802_v48 = vsub.f32 %v3623_v55, %v3544_v17  ;;  %v1803_v51 = vsub.f32 %v3652_v25, %v3573_v30 }
 0x106   :  { %3326 = vmatpush1.bf16.msra.mxu1 %v3325_v54  ;;  %v3327_v59 = vpack.c.bf16 %v1821_v33, %v1813_v44  ;;  %1756 = vmatprep.mubr.f32.mxu1 %v3430_v5  ;;  %v1812_v60 = vmax.f32 %v1798_v43, 0.0  ;;  %v1820_v63 = vmax.f32 %v1799_v45, 0.0  ;;  %v1806_v0 = vsub.f32 %v3623_v55, %v3628_v57 }
 0x107   :  { %v3331_v21 = vpack.c.bf16 %v1823_v47, %v1815_v46  ;;  %v1814_v23 = vmax.f32 %v1802_v48, 0.0  ;;  %v1822_v1 = vmax.f32 %v1803_v51, 0.0  ;;  %v1807_v15 = vsub.f32 %v3652_v25, %v3658_v27 }
 0x108   :  { %3328 = vmatprep.subr.bf16.mxu0 %v3327_v59  ;;  %3245 = vmatmul.mubr.msk.f32.vlgmr.msra.gmra.mrb[22].mxu0 %vm429_vm2, %v3673_v39  ;;  %v3329_v41 = vpack.c.bf16 %v1820_v63, %v1812_v60  ;;  %v1817_v35 = vmax.f32 %v1806_v0, 0.0  ;;  %v1810_v4 = vsub.f32 %v3623_v55, %v3630_v58  ;;  %v1811_v52 = vsub.f32 %v3652_v25, %v3660_v28 }
 0x109   :  { %3332 = vmatprep.subr.bf16.mxu1 %v3331_v21  ;;  %3246 = vmatmul.mubr.msk.f32.vlgmr.msra.gmra.mrb[22].mxu1 %vm429_vm2, %v3673_v39  ;;  %v3333_v22 = vpack.c.bf16 %v1822_v1, %v1814_v23  ;;  %v1825_v6 = vmax.f32 %v1807_v15, 0.0  ;;  %v1816_v7 = vmax.f32 %v3623_v55, 0.0  ;;  %v1824_v12 = vmax.f32 %v3652_v25, 0.0 }
 0x10a   :  { %3330 = vmatpush1.bf16.msra.mxu0 %v3329_v41  ;;  %v1819_v13 = vmax.f32 %v1810_v4, 0.0  ;;  %v1827_v36 = vmax.f32 %v1811_v52, 0.0  ;;  %1892 = vmatprep.mubr.f32.mxu0 %v3430_v5  ;;  %v1808_v53 = vsub.f32 %v3623_v55, %v3613_v50  ;;  %v1809_v14 = vsub.f32 %v3652_v25, %v3644_v11 }
 0x10b   :  { %3334 = vmatpush1.bf16.msra.mxu1 %v3333_v22  ;;  %v3335_v34 = vpack.c.bf16 %v1825_v6, %v1817_v35  ;;  %1963 = vmatprep.mubr.f32.mxu1 %v3430_v5  ;;  %v3337_v24 = vpack.c.bf16 %v1824_v12, %v1816_v7  ;;  %v2149_v42 = vsub.f32 %v3633_v61, %v3549_v19  ;;  %v2166_v44 = vmax.f32 %v3633_v61, 0.0 }
 0x10c   :  { %v3339_v40 = vpack.c.bf16 %v1827_v36, %v1819_v13  ;;  %v1818_v32 = vmax.f32 %v1808_v53, 0.0  ;;  %v1826_v54 = vmax.f32 %v1809_v14, 0.0  ;;  %v2150_v33 = vsub.f32 %v3664_v18, %v3590_v37 }
 0x10d   :  { %3336 = vmatprep.subr.bf16.mxu0 %v3335_v34  ;;  %3247 = vmatmul.mubr.msk.f32.vlgmr.msra.gmra.mrb[24].mxu0 %vm429_vm2, %v3673_v39  ;;  %v2162_v55 = vmax.f32 %v2149_v42, 0.0  ;;  %v2153_v25 = vsub.f32 %v3633_v61, %v3551_v20  ;;  %v2154_v43 = vsub.f32 %v3664_v18, %v3592_v38  ;;  %v2147_v45 = vsub.f32 %v3633_v61, %v3542_v16 }
 0x10e   :  { %3340 = vmatprep.subr.bf16.mxu1 %v3339_v40  ;;  %3248 = vmatmul.mubr.msk.f32.vlgmr.msra.gmra.mrb[24].mxu1 %vm429_vm2, %v3673_v39  ;;  %v3341_v46 = vpack.c.bf16 %v1826_v54, %v1818_v32  ;;  %v2170_v47 = vmax.f32 %v2150_v33, 0.0  ;;  %v2148_v48 = vsub.f32 %v3664_v18, %v3571_v29  ;;  %v2151_v51 = vsub.f32 %v3633_v61, %v3544_v17 }
 0x10f   :  { %3338 = vmatpush1.bf16.msra.mxu0 %v3337_v24  ;;  %v2164_v59 = vmax.f32 %v2153_v25, 0.0  ;;  %v2172_v60 = vmax.f32 %v2154_v43, 0.0  ;;  %2034 = vmatprep.mubr.f32.mxu0 %v3430_v5  ;;  %v2161_v63 = vmax.f32 %v2147_v45, 0.0  ;;  %v2152_v0 = vsub.f32 %v3664_v18, %v3573_v30 }
 0x110   :  { %3342 = vmatpush1.bf16.msra.mxu1 %v3341_v46  ;;  %v3343_v21 = vpack.c.bf16 %v2170_v47, %v2162_v55  ;;  %2105 = vmatprep.mubr.f32.mxu1 %v3430_v5  ;;  %v2169_v23 = vmax.f32 %v2148_v48, 0.0  ;;  %v2163_v1 = vmax.f32 %v2151_v51, 0.0  ;;  %v2174_v15 = vmax.f32 %v3664_v18, 0.0 }
 0x111   :  { %v3347_v41 = vpack.c.bf16 %v2172_v60, %v2164_v59  ;;  %v2171_v35 = vmax.f32 %v2152_v0, 0.0  ;;  %v2159_v4 = vsub.f32 %v3633_v61, %v3630_v58  ;;  %v2160_v52 = vsub.f32 %v3664_v18, %v3660_v28 }
 0x112   :  { %3344 = vmatprep.subr.bf16.mxu0 %v3343_v21  ;;  %3249 = vmatmul.mubr.msk.f32.vlgmr.msra.gmra.mrb[26].mxu0 %vm429_vm2, %v3673_v39  ;;  %v3345_v22 = vpack.c.bf16 %v2169_v23, %v2161_v63  ;;  %v3351_v6 = vpack.c.bf16 %v2174_v15, %v2166_v44  ;;  %v2155_v7 = vsub.f32 %v3633_v61, %v3611_v49  ;;  %v2516_v12 = vmax.f32 %v3626_v56, 0.0 }
 0x113   :  { %3348 = vmatprep.subr.bf16.mxu1 %v3347_v41  ;;  %3250 = vmatmul.mubr.msk.f32.vlgmr.msra.gmra.mrb[26].mxu1 %vm429_vm2, %v3673_v39  ;;  %v3349_v13 = vpack.c.bf16 %v2171_v35, %v2163_v1  ;;  %v2168_v36 = vmax.f32 %v2159_v4, 0.0  ;;  %v2176_v53 = vmax.f32 %v2160_v52, 0.0  ;;  %v2156_v14 = vsub.f32 %v3664_v18, %v3642_v9 }
 0x114   :  { %3346 = vmatpush1.bf16.msra.mxu0 %v3345_v22  ;;  %2241 = vmatprep.mubr.f32.mxu0 %v3430_v5  ;;  %v2165_v34 = vmax.f32 %v2155_v7, 0.0  ;;  %v2157_v24 = vsub.f32 %v3633_v61, %v3613_v50  ;;  %v2158_v42 = vsub.f32 %v3664_v18, %v3644_v11  ;;  %v2498_v44 = vsub.f32 %v3626_v56, %v3549_v19 }
 0x115   :  { %3350 = vmatpush1.bf16.msra.mxu1 %v3349_v13  ;;  %3352 = vmatprep.subr.bf16.mxu0 %v3351_v6  ;;  %v3355_v40 = vpack.c.bf16 %v2176_v53, %v2168_v36  ;;  %v2173_v32 = vmax.f32 %v2156_v14, 0.0  ;;  %v2499_v54 = vsub.f32 %v3656_v26, %v3590_v37  ;;  %v2502_v33 = vsub.f32 %v3626_v56, %v3551_v20 }
 0x116   :  { %2312 = vmatprep.mubr.f32.mxu1 %v3430_v5  ;;  %v2167_v55 = vmax.f32 %v2157_v24, 0.0  ;;  %v2175_v61 = vmax.f32 %v2158_v42, 0.0  ;;  %v2511_v25 = vmax.f32 %v2498_v44, 0.0  ;;  %v2503_v18 = vsub.f32 %v3656_v26, %v3592_v38 }
 0x117   :  { %3356 = vmatprep.subr.bf16.mxu1 %v3355_v40  ;;  %3251 = vmatmul.mubr.msk.f32.vlgmr.msra.gmra.mrb[28].mxu0 %vm429_vm2, %v3673_v39  ;;  %v3353_v43 = vpack.c.bf16 %v2173_v32, %v2165_v34  ;;  %v2519_v45 = vmax.f32 %v2499_v54, 0.0  ;;  %v2513_v46 = vmax.f32 %v2502_v33, 0.0  ;;  %v2496_v47 = vsub.f32 %v3626_v56, %v3542_v16 }
 0x118   :  { %3252 = vmatmul.mubr.msk.f32.vlgmr.msra.gmra.mrb[28].mxu1 %vm429_vm2, %v3673_v39  ;;  %v3357_v48 = vpack.c.bf16 %v2175_v61, %v2167_v55  ;;  %v2521_v51 = vmax.f32 %v2503_v18, 0.0  ;;  %2383 = vmatprep.mubr.f32.mxu0 %v3430_v5  ;;  %v2497_v59 = vsub.f32 %v3656_v26, %v3571_v29  ;;  %v2500_v60 = vsub.f32 %v3626_v56, %v3544_v17 }
 0x119   :  { %3354 = vmatpush1.bf16.msra.mxu0 %v3353_v43  ;;  %v3359_v63 = vpack.c.bf16 %v2519_v45, %v2511_v25  ;;  %2454 = vmatprep.mubr.f32.mxu1 %v3430_v5  ;;  %v2510_v0 = vmax.f32 %v2496_v47, 0.0  ;;  %v2501_v21 = vsub.f32 %v3656_v26, %v3573_v30  ;;  %v2506_v23 = vsub.f32 %v3626_v56, %v3628_v57 }
 0x11a   :  { %3358 = vmatpush1.bf16.msra.mxu1 %v3357_v48  ;;  %v3363_v1 = vpack.c.bf16 %v2521_v51, %v2513_v46  ;;  %v2518_v15 = vmax.f32 %v2497_v59, 0.0  ;;  %v2512_v41 = vmax.f32 %v2500_v60, 0.0  ;;  %v2507_v35 = vsub.f32 %v3656_v26, %v3658_v27 }
 0x11b   :  { %3360 = vmatprep.subr.bf16.mxu0 %v3359_v63  ;;  %v2520_v4 = vmax.f32 %v2501_v21, 0.0  ;;  %v2515_v52 = vmax.f32 %v2506_v23, 0.0  ;;  %v2508_v22 = vsub.f32 %v3626_v56, %v3630_v58  ;;  %v2509_v6 = vsub.f32 %v3656_v26, %v3660_v28 }
 0x11c   :  { %3364 = vmatprep.subr.bf16.mxu1 %v3363_v1  ;;  %3253 = vmatmul.mubr.msk.f32.vlgmr.msra.gmra.mrb[30].mxu0 %vm429_vm2, %v3673_v39  ;;  %v3361_v7 = vpack.c.bf16 %v2518_v15, %v2510_v0  ;;  %v2523_v13 = vmax.f32 %v2507_v35, 0.0  ;;  %v2504_v36 = vsub.f32 %v3626_v56, %v3611_v49  ;;  %v2505_v53 = vsub.f32 %v3656_v26, %v3642_v9 }
 0x11d   :  { %3254 = vmatmul.mubr.msk.f32.vlgmr.msra.gmra.mrb[30].mxu1 %vm429_vm2, %v3673_v39  ;;  %v3365_v14 = vpack.c.bf16 %v2520_v4, %v2512_v41  ;;  %v2517_v58 = vmax.f32 %v2508_v22, 0.0  ;;  %v2525_v34 = vmax.f32 %v2509_v6, 0.0  ;;  %2590 = vmatprep.mubr.f32.mxu0 %v3430_v5  ;;  %v2524_v28 = vmax.f32 %v3656_v26, 0.0  ;;  %v3995_v22 = vld [vmem:[%s4220_s0] sm:$0xf] }
 0x11e   :  { %3362 = vmatpush1.bf16.msra.mxu0 %v3361_v7  ;;  %v3367_v24 = vpack.c.bf16 %v2523_v13, %v2515_v52  ;;  %2661 = vmatprep.mubr.f32.mxu1 %v3430_v5  ;;  %v2514_v42 = vmax.f32 %v2504_v36, 0.0  ;;  %v2522_v44 = vmax.f32 %v2505_v53, 0.0  ;;  %v2847_v40 = vsub.f32 %v3636_v62, %v3549_v19  ;;  %v4002_v6 = vld [vmem:[%s4220_s0 + $0xc] sm:$0xf]  ;;  %v4012_v36 = vld [vmem:[%s4220_s0 + $0x8] sm:$0xf] }
 0x11f   :  { %3366 = vmatpush1.bf16.msra.mxu1 %v3365_v14  ;;  %v3371_v32 = vpack.c.bf16 %v2525_v34, %v2517_v58  ;;  %v3373_v54 = vpack.c.bf16 %v2524_v28, %v2516_v12  ;;  %v2848_v33 = vsub.f32 %v3668_v31, %v3590_v37  ;;  %v2851_v26 = vsub.f32 %v3636_v62, %v3551_v20 }
 0x120   :  { %3368 = vmatprep.subr.bf16.mxu0 %v3367_v24  ;;  %v3369_v55 = vpack.c.bf16 %v2522_v44, %v2514_v42  ;;  %v2860_v61 = vmax.f32 %v2847_v40, 0.0  ;;  %v2852_v25 = vsub.f32 %v3668_v31, %v3592_v38  ;;  %v2845_v19 = vsub.f32 %v3636_v62, %v3542_v16 }
 0x121   :  { %3372 = vmatprep.subr.bf16.mxu1 %v3371_v32  ;;  %3255 = vmatmul.mubr.msk.f32.vlgmr.msra.gmra.mrb[32].mxu0 %vm429_vm2, %v3673_v39  ;;  %v2868_v56 = vmax.f32 %v2848_v33, 0.0  ;;  %v2862_v12 = vmax.f32 %v2851_v26, 0.0  ;;  %v2846_v37 = vsub.f32 %v3668_v31, %v3571_v29  ;;  %v2849_v20 = vsub.f32 %v3636_v62, %v3544_v17 }
 0x122   :  { %3256 = vmatmul.mubr.msk.f32.vlgmr.msra.gmra.mrb[32].mxu1 %vm429_vm2, %v3673_v39  ;;  %3370 = vmatpush1.bf16.msra.mxu0 %v3369_v55  ;;  %v2870_v38 = vmax.f32 %v2852_v25, 0.0  ;;  %v2859_v18 = vmax.f32 %v2845_v19, 0.0  ;;  %v2850_v16 = vsub.f32 %v3668_v31, %v3573_v30  ;;  %v2855_v43 = vsub.f32 %v3636_v62, %v3628_v57  ;;  %v4031_v55 = vld [vmem:[%s4220_s0 + $0x10] sm:$0xf]  ;;  %v4038_v25 = vld [vmem:[%s4220_s0 + $0x18] sm:$0xf] }
 0x123   :  { %3374 = vmatpush1.bf16.msra.mxu1 %v3373_v54  ;;  %v3375_v45 = vpack.c.bf16 %v2868_v56, %v2860_v61  ;;  %2803 = vmatprep.mubr.f32.mxu1 %v3430_v5  ;;  %v2867_v29 = vmax.f32 %v2846_v37, 0.0  ;;  %v2861_v46 = vmax.f32 %v2849_v20, 0.0  ;;  %v2856_v17 = vsub.f32 %v3668_v31, %v3658_v27 }
 0x124   :  { %v3379_v47 = vpack.c.bf16 %v2870_v38, %v2862_v12  ;;  %2732 = vmatprep.mubr.f32.mxu0 %v3430_v5  ;;  %v2869_v48 = vmax.f32 %v2850_v16, 0.0  ;;  %v2864_v51 = vmax.f32 %v2855_v43, 0.0  ;;  %v2866_v59 = vmax.f32 %v3636_v62, 0.0  ;;  %v4051_v43 = vld [vmem:[%s4220_s0 + $0x14] sm:$0xf] }
 0x125   :  { %3376 = vmatprep.subr.bf16.mxu0 %v3375_v45  ;;  %3257 = vmatmul.mubr.msk.f32.vlgmr.msra.gmra.mrb[34].mxu0 %vm429_vm2, %v3673_v39  ;;  %v3377_v30 = vpack.c.bf16 %v2867_v29, %v2859_v18  ;;  %v2872_v57 = vmax.f32 %v2856_v17, 0.0  ;;  %v2874_v60 = vmax.f32 %v3668_v31, 0.0  ;;  %v2853_v63 = vsub.f32 %v3636_v62, %v3611_v49 }
 0x126   :  { %3380 = vmatprep.subr.bf16.mxu1 %v3379_v47  ;;  %3258 = vmatmul.mubr.msk.f32.vlgmr.msra.gmra.mrb[34].mxu1 %vm429_vm2, %v3673_v39  ;;  %v3381_v27 = vpack.c.bf16 %v2869_v48, %v2861_v46  ;;  %v2854_v0 = vsub.f32 %v3668_v31, %v3642_v9  ;;  %v2857_v21 = vsub.f32 %v3636_v62, %v3613_v50 }
 0x127   :  { %3378 = vmatpush1.bf16.msra.mxu0 %v3377_v30  ;;  %v3383_v23 = vpack.c.bf16 %v2872_v57, %v2864_v51  ;;  %v3387_v1 = vpack.c.bf16 %v2874_v60, %v2866_v59  ;;  %3010 = vmatprep.mubr.f32.mxu1 %v3430_v5  ;;  %v2858_v15 = vsub.f32 %v3668_v31, %v3644_v11  ;;  %v2863_v49 = vmax.f32 %v2853_v63, 0.0  ;;  %v3985_v11 = vld [vmem:[%s4220_s0 + $0x4] sm:$0xf]  ;;  %v4059_v59 = vld [vmem:[%s4220_s0 + $0x1c] sm:$0xf]  ;;  %s3432_s0 = smov [#allocation2]  }
 0x128   :  { %3382 = vmatpush1.bf16.msra.mxu1 %v3381_v27  ;;  %2939 = vmatprep.mubr.f32.mxu0 %v3430_v5  ;;  %v2871_v41 = vmax.f32 %v2854_v0, 0.0  ;;  %v2865_v35 = vmax.f32 %v2857_v21, 0.0  ;;  %v718_v31 = vsub.f32 %v3476_v2, %v3985_v11  ;;  %v726_v7 = vsub.f32 %v3995_v22, %v4002_v6  ;;  %s3197_s8 = sshll.u32 %s3432_s0, 4  ;;  %s3198_s8 = int_to_ptr.vmem [resolvable:$true] %s3197_s8 }
 0x129   :  { %3384 = vmatprep.subr.bf16.mxu0 %v3383_v23  ;;  %3388 = vmatprep.subr.bf16.mxu1 %v3387_v1  ;;  %v2873_v9 = vmax.f32 %v2858_v15, 0.0  ;;  %v1070_v53 = vsub.f32 %v3985_v11, %v4012_v36  ;;  %v734_v58 = vsub.f32 %v3995_v22, %v3503_v8  ;;  %v4020_v28 = vsub.f32 %v4012_v36, %v3995_v22  ;;  %v4071_v15 = vpop.permute.xlu1 %39  ;;  %s3406_s9 = scalar_lea.vmem %s3198_s8, 512  ;;  %p3411_p1 = scmp.lt.s32.totalorder %s3198_s8, %s3198_s8 }
 0x12a   :  { %3259 = vmatmul.mubr.msk.f32.vlgmr.msra.gmra.mrb[36].mxu0 %vm429_vm2, %v3673_v39  ;;  %v3385_v50 = vpack.c.bf16 %v2871_v41, %v2863_v49  ;;  %v721_v4 = vadd.f32 %v718_v31, %v3476_v2  ;;  %v4024_v42 = vsub.f32 %v3985_v11, %v4002_v6  ;;  %v1078_v61 = vsub.f32 %v3985_v11, %v4031_v55  ;;  %p3407_p0 = scmp.ne.s32.totalorder %s3198_s8, %s3406_s9  ;;  %p3412_p2 = scmp.lt.s32.totalorder %s3406_s9, %s3406_s9 }
 0x12b   :  { %3260 = vmatmul.mubr.msk.f32.vlgmr.msra.gmra.mrb[36].mxu1 %vm429_vm2, %v3673_v39  ;;  %v3389_v62 = vpack.c.bf16 %v2873_v9, %v2865_v35  ;;  %3081 = vmatprep.mubr.f32.mxu0 %v3430_v5  ;;  %v738_v19 = vsub.f32 %v3995_v22, %v4038_v25  ;;  %v1418_v56 = vadd.f32 %v4012_v36, %v4020_v28 }
 0x12c   :  { %3386 = vmatpush1.bf16.msra.mxu0 %v3385_v50  ;;  %3152 = vmatprep.mubr.f32.mxu1 %v3430_v5  ;;  %v722_v5 = vsub.f32 %v3476_v2, %v3481_v3  ;;  %v730_v2 = vsub.f32 %v3995_v22, %v3515_v10  ;;  %v4046_v12 = vsub.f32 %v4012_v36, %v3985_v11  ;;  %p3413_p3 = por %p3412_p2, %p3411_p1 }
 0x12d   :  { %3390 = vmatpush1.bf16.msra.mxu1 %v3389_v62  ;;  %v1082_v45 = vsub.f32 %v3985_v11, %v4051_v43  ;;  %v742_v30 = vsub.f32 %v3995_v22, %v4059_v59  ;;  %v4065_v57 = vsub.f32 %v4002_v6, %v3995_v22  ;;  %v4069_v27 = vsub.f32 %v4012_v36, %v4002_v6 }
 0x12e   :  { %v725_v52 = vadd.f32 %v722_v5, %v721_v4  ;;  %v1422_v46 = vadd.f32 %v4046_v12, %v1418_v56  ;;  %v1086_v49 = vsub.f32 %v3985_v11, %v4038_v25  ;;  %v4078_v35 = vsub.f32 %v4012_v36, %v4031_v55  ;;  %p3414_p4 = pnand %p3413_p3, %p3407_p0 }
 0x12f   :  { %3261 = vmatmul.mubr.msk.f32.vlgmr.msra.gmra.mrb[38].mxu0 %vm429_vm2, %v3673_v39  ;;  %v4082_v9 = vsub.f32 %v4002_v6, %v3985_v11 }
 0x130   :  { %3262 = vmatmul.mubr.msk.f32.vlgmr.msra.gmra.mrb[38].mxu1 %vm429_vm2, %v3673_v39  ;;  %v1066_v39 = vsub.f32 %v3985_v11, %v3995_v22  ;;  %v729_v13 = vadd.f32 %v726_v7, %v725_v52  ;;  %v1426_v41 = vadd.f32 %v4069_v27, %v1422_v46  ;;  %v1767_v52 = vadd.f32 %v4002_v6, %v4065_v57 }
 0x132   :  { %v1069_v3 = vadd.f32 %v3985_v11, %v1066_v39  ;;  %v733_v14 = vadd.f32 %v730_v2, %v729_v13 }
 0x134   :  { %v1073_v34 = vadd.f32 %v1070_v53, %v1069_v3  ;;  %v737_v54 = vadd.f32 %v734_v58, %v733_v14 }
 0x136   :  { %v1077_v8 = vadd.f32 %v4024_v42, %v1073_v34  ;;  %v741_v20 = vadd.f32 %v738_v19, %v737_v54  ;;  %v1090_v54 = vsub.f32 %v3985_v11, %v4059_v59 }
 0x138   :  { %v1081_v16 = vadd.f32 %v1078_v61, %v1077_v8  ;;  %v745_v21 = vadd.f32 %v742_v30, %v741_v20 }
 0x13a   :  { %v1085_v23 = vadd.f32 %v1082_v45, %v1081_v16  ;;  %v746_v14 = vmul.f32 %v745_v21, %v4071_v15  ;;  %v1780_v21 = vsub.f32 %v4002_v6, %v4051_v43 }
 0x1bb   :  { %v499_v10 = vpop.f32.mrb[8].mxu0  ;;  %v570_v24 = vpop.f32.mrb[8].mxu1 }
 0x1bc   :  { %v717_v44 = vmul.f32 %v3995_v22, %v499_v10  ;;  %v501_v40 = vpop.f32.mrb[9].mxu0  ;;  %v572_v32 = vpop.f32.mrb[9].mxu1  ;;  %v723_v26 = vmul.f32 %v722_v5, %v570_v24 }
 0x1bd   :  { %v719_v33 = vmul.f32 %v718_v31, %v501_v40  ;;  %v727_v18 = vmul.f32 %v726_v7, %v572_v32 }
 0x1bf   :  { %v720_v37 = vadd.f32 %v719_v33, %v717_v44  ;;  %v1430_v44 = vadd.f32 %v4078_v35, %v1426_v41 }
 0x1c1   :  { %v724_v38 = vadd.f32 %v723_v26, %v720_v37  ;;  %v1771_v26 = vadd.f32 %v4082_v9, %v1767_v52 }
 0x1c2   :  { %v641_v29 = vpop.f32.mrb[10].mxu0 }
 0x1c3   :  { %v728_v17 = vadd.f32 %v727_v18, %v724_v38  ;;  %v731_v47 = vmul.f32 %v730_v2, %v641_v29  ;;  %v712_v48 = vpop.f32.mrb[10].mxu1  ;;  %v643_v51 = vpop.f32.mrb[11].mxu0  ;;  %v4097_v38 = vsub.f32 %v4002_v6, %v4012_v36 }
 0x1c4   :  { %v735_v60 = vmul.f32 %v734_v58, %v643_v51  ;;  %v714_v63 = vpop.f32.mrb[11].mxu1  ;;  %v739_v50 = vmul.f32 %v738_v19, %v712_v48  ;;  %v1089_v58 = vadd.f32 %v1086_v49, %v1085_v23 }
 0x1c5   :  { %v732_v0 = vadd.f32 %v731_v47, %v728_v17  ;;  %v743_v3 = vmul.f32 %v742_v30, %v714_v63  ;;  %v1775_v51 = vadd.f32 %v4097_v38, %v1771_v26 }
 0x1c6   :  { %v847_v1 = vpop.f32.mrb[12].mxu0  ;;  %v1093_v20 = vadd.f32 %v1090_v54, %v1089_v58  ;;  %v1439_v58 = vsub.f32 %v4012_v36, %v4059_v59 }
 0x1c7   :  { %v736_v62 = vadd.f32 %v735_v60, %v732_v0  ;;  %v1067_v31 = vmul.f32 %v1066_v39, %v847_v1  ;;  %v849_v4 = vpop.f32.mrb[13].mxu0  ;;  %v918_v5 = vpop.f32.mrb[12].mxu1  ;;  %v1431_v39 = vsub.f32 %v4012_v36, %v4051_v43 }
 0x1c8   :  { %v1065_v7 = vmul.f32 %v3985_v11, %v849_v4  ;;  %v920_v13 = vpop.f32.mrb[13].mxu1  ;;  %v1071_v10 = vmul.f32 %v1070_v53, %v918_v5  ;;  %v1094_v0 = vmul.f32 %v1093_v20, %v4071_v15 }
 0x1c9   :  { %v740_v2 = vadd.f32 %v739_v50, %v736_v62  ;;  %v1075_v19 = vmul.f32 %v4024_v42, %v920_v13  ;;  %v1434_v46 = vadd.f32 %v1431_v39, %v1430_v44  ;;  %v1776_v42 = vsub.f32 %v4002_v6, %v4031_v55 }
 0x1ca   :  { %v1068_v34 = vadd.f32 %v1067_v31, %v1065_v7  ;;  %v989_v24 = vpop.f32.mrb[14].mxu0  ;;  %v4118_v7 = vsub.f32 %v4031_v55, %v3985_v11 }
 0x1cb   :  { %v744_v40 = vadd.f32 %v743_v3, %v740_v2  ;;  %v1060_v32 = vpop.f32.mrb[14].mxu1  ;;  %v991_v33 = vpop.f32.mrb[15].mxu0  ;;  %v1079_v56 = vmul.f32 %v1078_v61, %v989_v24  ;;  %v4105_v61 = vsub.f32 %v4031_v55, %v3995_v22  ;;  %v1779_v52 = vadd.f32 %v1776_v42, %v1775_v51 }
 0x1cc   :  { %v1072_v8 = vadd.f32 %v1071_v10, %v1068_v34  ;;  %v1062_v37 = vpop.f32.mrb[15].mxu1  ;;  %v1083_v16 = vmul.f32 %v1082_v45, %v991_v33  ;;  %v1087_v23 = vmul.f32 %v1086_v49, %v1060_v32 }
 0x1cd   :  { %v747_v53 = vadd.f32 %v746_v14, %v744_v40  ;;  %v1091_v31 = vmul.f32 %v1090_v54, %v1062_v37 }
 0x1ce   :  { %v1076_v18 = vadd.f32 %v1075_v19, %v1072_v8  ;;  %v1196_v29 = vpop.f32.mrb[16].mxu0 }
 0x1cf   :  { %748 = vst [vmem:[#allocation2] sm:$0xf] %v747_v53  ;;  %v1416_v17 = vmul.f32 %v4020_v28, %v1196_v29  ;;  %v1267_v47 = vpop.f32.mrb[16].mxu1  ;;  %v1198_v48 = vpop.f32.mrb[17].mxu0  ;;  %v1435_v28 = vsub.f32 %v4012_v36, %v4038_v25 }
 0x1d0   :  { %v1080_v30 = vadd.f32 %v1079_v56, %v1076_v18  ;;  %v1414_v60 = vmul.f32 %v4012_v36, %v1267_v47  ;;  %v1420_v45 = vmul.f32 %v4046_v12, %v1198_v48  ;;  %v1269_v63 = vpop.f32.mrb[17].mxu1  ;;  %v2116_v12 = vadd.f32 %v4031_v55, %v4105_v61 }
 0x1d1   :  { %v1438_v62 = vadd.f32 %v1435_v28, %v1434_v46  ;;  %v1424_v3 = vmul.f32 %v4069_v27, %v1269_v63  ;;  %v1783_v56 = vadd.f32 %v1780_v21, %v1779_v52 }
 0x1d2   :  { %v1084_v1 = vadd.f32 %v1083_v16, %v1080_v30  ;;  %v1417_v41 = vadd.f32 %v1416_v17, %v1414_v60  ;;  %v1338_v50 = vpop.f32.mrb[18].mxu0  ;;  %v2120_v27 = vadd.f32 %v4118_v7, %v2116_v12 }
 0x1d3   :  { %v1409_v4 = vpop.f32.mrb[18].mxu1  ;;  %v1340_v5 = vpop.f32.mrb[19].mxu0  ;;  %v1428_v49 = vmul.f32 %v4078_v35, %v1338_v50  ;;  %v1442_v40 = vadd.f32 %v1439_v58, %v1438_v62  ;;  %v2125_v50 = vsub.f32 %v4031_v55, %v4002_v6 }
 0x1d4   :  { %v1088_v13 = vadd.f32 %v1087_v23, %v1084_v1  ;;  %v1421_v2 = vadd.f32 %v1420_v45, %v1417_v41  ;;  %v1411_v14 = vpop.f32.mrb[19].mxu1  ;;  %v1432_v24 = vmul.f32 %v1431_v39, %v1340_v5  ;;  %v1436_v53 = vmul.f32 %v1435_v28, %v1409_v4 }
 0x1d5   :  { %v1784_v39 = vsub.f32 %v4002_v6, %v4038_v25  ;;  %v1443_v18 = vmul.f32 %v1442_v40, %v4071_v15  ;;  %v1440_v46 = vmul.f32 %v1439_v58, %v1411_v14  ;;  %v2462_v28 = vsub.f32 %v4051_v43, %v3995_v22 }
 0x1d6   :  { %v1092_v34 = vadd.f32 %v1091_v31, %v1088_v13  ;;  %v1425_v10 = vadd.f32 %v1424_v3, %v1421_v2  ;;  %v1545_v44 = vpop.f32.mrb[20].mxu0  ;;  %v1788_v23 = vsub.f32 %v4002_v6, %v4059_v59 }
 0x1d7   :  { %v1616_v32 = vpop.f32.mrb[20].mxu1  ;;  %v1765_v54 = vmul.f32 %v4065_v57, %v1545_v44  ;;  %v1547_v33 = vpop.f32.mrb[21].mxu0  ;;  %v2121_v57 = vsub.f32 %v4031_v55, %v4012_v36  ;;  %v1787_v51 = vadd.f32 %v1784_v39, %v1783_v56  ;;  %v2133_v56 = vsub.f32 %v4031_v55, %v4038_v25 }
 0x1d8   :  { %v1095_v26 = vadd.f32 %v1094_v0, %v1092_v34  ;;  %v1429_v8 = vadd.f32 %v1428_v49, %v1425_v10  ;;  %v1618_v19 = vpop.f32.mrb[21].mxu1  ;;  %v1769_v37 = vmul.f32 %v4082_v9, %v1547_v33  ;;  %v1773_v9 = vmul.f32 %v4097_v38, %v1616_v32 }
 0x1d9   :  { %v1763_v35 = vmul.f32 %v4002_v6, %v1618_v19  ;;  %v2124_v30 = vadd.f32 %v2121_v57, %v2120_v27  ;;  %v1791_v31 = vadd.f32 %v1788_v23, %v1787_v51  ;;  %v2129_v49 = vsub.f32 %v4031_v55, %v4051_v43 }
 0x1da   :  { %1097 = vst [vmem:[#allocation2 + $0x4] sm:$0xf] %v1095_v26  ;;  %v1433_v20 = vadd.f32 %v1432_v24, %v1429_v8  ;;  %v4151_v8 = vsub.f32 %v4038_v25, %v3995_v22  ;;  %v2470_v27 = vsub.f32 %v4051_v43, %v4012_v36  ;;  %v2137_v51 = vsub.f32 %v4031_v55, %v4059_v59 }
 0x1db   :  { %v1766_v16 = vadd.f32 %v1765_v54, %v1763_v35  ;;  %v1687_v29 = vpop.f32.mrb[22].mxu0  ;;  %v2128_v12 = vadd.f32 %v2125_v50, %v2124_v30  ;;  %v1792_v14 = vmul.f32 %v1791_v31, %v4071_v15 }
 0x1dc   :  { %v1437_v17 = vadd.f32 %v1436_v53, %v1433_v20  ;;  %v1758_v47 = vpop.f32.mrb[22].mxu1  ;;  %v1689_v48 = vpop.f32.mrb[23].mxu0  ;;  %v1777_v63 = vmul.f32 %v1776_v42, %v1687_v29  ;;  %v2465_v42 = vadd.f32 %v4051_v43, %v2462_v28  ;;  %v2815_v29 = vsub.f32 %v4038_v25, %v3985_v11 }
 0x1dd   :  { %v1770_v60 = vadd.f32 %v1769_v37, %v1766_v16  ;;  %v1760_v45 = vpop.f32.mrb[23].mxu1  ;;  %v1781_v41 = vmul.f32 %v1780_v21, %v1689_v48  ;;  %v1785_v2 = vmul.f32 %v1784_v39, %v1758_v47  ;;  %v2466_v21 = vsub.f32 %v4051_v43, %v3985_v11 }
 0x1de   :  { %v1441_v0 = vadd.f32 %v1440_v46, %v1437_v17  ;;  %v1789_v34 = vmul.f32 %v1788_v23, %v1760_v45  ;;  %v2132_v44 = vadd.f32 %v2129_v49, %v2128_v12  ;;  %v2814_v16 = vadd.f32 %v4038_v25, %v4151_v8 }
 0x1df   :  { %v1774_v1 = vadd.f32 %v1773_v9, %v1770_v60  ;;  %v2469_v40 = vadd.f32 %v2466_v21, %v2465_v42  ;;  %v2474_v17 = vsub.f32 %v4051_v43, %v4002_v6  ;;  %v4172_v42 = vsub.f32 %v4059_v59, %v3995_v22 }
 0x1e0   :  { %v1444_v62 = vadd.f32 %v1443_v18, %v1441_v0  ;;  %v1894_v4 = vpop.f32.mrb[24].mxu0  ;;  %v2136_v53 = vadd.f32 %v2133_v56, %v2132_v44  ;;  %v2818_v0 = vadd.f32 %v2815_v29, %v2814_v16 }
 0x1e1   :  { %v1778_v5 = vadd.f32 %v1777_v63, %v1774_v1  ;;  %v1965_v38 = vpop.f32.mrb[24].mxu1  ;;  %v1896_v52 = vpop.f32.mrb[25].mxu0  ;;  %v2114_v58 = vmul.f32 %v4105_v61, %v1894_v4 }
 0x1e2   :  { %1446 = vst [vmem:[#allocation2 + $0x8] sm:$0xf] %v1444_v62  ;;  %v1967_v13 = vpop.f32.mrb[25].mxu1  ;;  %v2118_v32 = vmul.f32 %v4118_v7, %v1896_v52  ;;  %v2473_v7 = vadd.f32 %v2470_v27, %v2469_v40  ;;  %v2122_v20 = vmul.f32 %v2121_v57, %v1965_v38  ;;  %v2140_v63 = vadd.f32 %v2137_v51, %v2136_v53 }
 0x1e3   :  { %v1782_v3 = vadd.f32 %v1781_v41, %v1778_v5  ;;  %v2126_v48 = vmul.f32 %v2125_v50, %v1967_v13  ;;  %v2478_v41 = vsub.f32 %v4051_v43, %v4031_v55  ;;  %v2819_v50 = vsub.f32 %v4038_v25, %v4012_v36 }
 0x1e4   :  { %v2477_v9 = vadd.f32 %v2474_v17, %v2473_v7  ;;  %v2827_v7 = vsub.f32 %v4038_v25, %v4031_v55 }
 0x1e5   :  { %v1786_v10 = vadd.f32 %v1785_v2, %v1782_v3  ;;  %v2036_v24 = vpop.f32.mrb[26].mxu0  ;;  %v2141_v2 = vmul.f32 %v2140_v63, %v4071_v15  ;;  %v2822_v3 = vadd.f32 %v2819_v50, %v2818_v0 }
 0x1e6   :  { %v2112_v54 = vmul.f32 %v4031_v55, %v2036_v24  ;;  %v2107_v33 = vpop.f32.mrb[26].mxu1  ;;  %v2038_v26 = vpop.f32.mrb[27].mxu0  ;;  %v2481_v38 = vadd.f32 %v2478_v41, %v2477_v9 }
 0x1e7   :  { %v1790_v19 = vadd.f32 %v1789_v34, %v1786_v10  ;;  %v2109_v61 = vpop.f32.mrb[27].mxu1  ;;  %v2130_v45 = vmul.f32 %v2129_v49, %v2038_v26  ;;  %v2134_v62 = vmul.f32 %v2133_v56, %v2107_v33  ;;  %v2823_v10 = vsub.f32 %v4038_v25, %v4002_v6 }
 0x1e8   :  { %v2115_v35 = vadd.f32 %v2114_v58, %v2112_v54  ;;  %v2482_v58 = vsub.f32 %v4051_v43, %v4038_v25  ;;  %v3163_v33 = vadd.f32 %v4059_v59, %v4172_v42 }
 0x1e9   :  { %v1793_v37 = vadd.f32 %v1792_v14, %v1790_v19 }
 0x1ea   :  { %v2119_v39 = vadd.f32 %v2118_v32, %v2115_v35  ;;  %v2243_v18 = vpop.f32.mrb[28].mxu0  ;;  %v2485_v32 = vadd.f32 %v2482_v58, %v2481_v38  ;;  %v2486_v35 = vsub.f32 %v4051_v43, %v4059_v59 }
 0x1eb   :  { %1795 = vst [vmem:[#allocation2 + $0xc] sm:$0xf] %v1793_v37  ;;  %v2314_v46 = vpop.f32.mrb[28].mxu1  ;;  %v2245_v47 = vpop.f32.mrb[29].mxu0  ;;  %v2463_v23 = vmul.f32 %v2462_v28, %v2243_v18  ;;  %v2138_v28 = vmul.f32 %v2137_v51, %v2109_v61  ;;  %v3164_v37 = vsub.f32 %v4059_v59, %v3985_v11 }
 0x1ec   :  { %v2123_v30 = vadd.f32 %v2122_v20, %v2119_v39  ;;  %v2316_v57 = vpop.f32.mrb[29].mxu1  ;;  %v2467_v49 = vmul.f32 %v2466_v21, %v2245_v47  ;;  %v2471_v44 = vmul.f32 %v2470_v27, %v2314_v46  ;;  %v2826_v21 = vadd.f32 %v2823_v10, %v2822_v3 }
 0x1ed   :  { %v2475_v56 = vmul.f32 %v2474_v17, %v2316_v57  ;;  %v2489_v18 = vadd.f32 %v2486_v35, %v2485_v32  ;;  %v3167_v17 = vadd.f32 %v3164_v37, %v3163_v33  ;;  %v3176_v3 = vsub.f32 %v4059_v59, %v4031_v55 }
 0x1ee   :  { %v2127_v60 = vadd.f32 %v2126_v48, %v2123_v30  ;;  %v2830_v30 = vadd.f32 %v2827_v7, %v2826_v21  ;;  %v3180_v21 = vsub.f32 %v4059_v59, %v4051_v43 }
 0x1ef   :  { %v2385_v1 = vpop.f32.mrb[30].mxu0  ;;  %v2490_v0 = vmul.f32 %v2489_v18, %v4071_v15 }
 0x1f0   :  { %v2131_v31 = vadd.f32 %v2130_v45, %v2127_v60  ;;  %v2387_v4 = vpop.f32.mrb[31].mxu0  ;;  %v2456_v5 = vpop.f32.mrb[30].mxu1  ;;  %v2479_v20 = vmul.f32 %v2478_v41, %v2385_v1  ;;  %v2831_v60 = vsub.f32 %v4038_v25, %v4051_v43 }
 0x1f1   :  { %v2461_v52 = vmul.f32 %v4051_v43, %v2387_v4  ;;  %v2458_v12 = vpop.f32.mrb[31].mxu1  ;;  %v2483_v11 = vmul.f32 %v2482_v58, %v2456_v5 }
 0x1f2   :  { %v2135_v13 = vadd.f32 %v2134_v62, %v2131_v31  ;;  %v2487_v63 = vmul.f32 %v2486_v35, %v2458_v12  ;;  %v2834_v31 = vadd.f32 %v2831_v60, %v2830_v30 }
 0x1f3   :  { %v2464_v14 = vadd.f32 %v2463_v23, %v2461_v52 }
 0x1f4   :  { %v2139_v34 = vadd.f32 %v2138_v28, %v2135_v13  ;;  %v2592_v24 = vpop.f32.mrb[32].mxu0  ;;  %v2835_v13 = vsub.f32 %v4038_v25, %v4059_v59 }
 0x1f5   :  { %v2468_v40 = vadd.f32 %v2467_v49, %v2464_v14  ;;  %v2663_v22 = vpop.f32.mrb[32].mxu1  ;;  %v2594_v54 = vpop.f32.mrb[33].mxu0  ;;  %v2812_v27 = vmul.f32 %v4151_v8, %v2592_v24  ;;  %v3168_v8 = vsub.f32 %v4059_v59, %v4012_v36  ;;  %v3172_v36 = vsub.f32 %v4059_v59, %v4002_v6 }
 0x1f6   :  { %v2142_v26 = vadd.f32 %v2141_v2, %v2139_v34  ;;  %v2665_v19 = vpop.f32.mrb[33].mxu1  ;;  %v2816_v48 = vmul.f32 %v2815_v29, %v2594_v54  ;;  %v2820_v41 = vmul.f32 %v2819_v50, %v2663_v22  ;;  %v2838_v14 = vadd.f32 %v2835_v13, %v2834_v31 }
 0x1f7   :  { %v2472_v61 = vadd.f32 %v2471_v44, %v2468_v40  ;;  %v3171_v1 = vadd.f32 %v3168_v8, %v3167_v17  ;;  %v2824_v52 = vmul.f32 %v2823_v10, %v2665_v19 }
 0x1f8   :  { %2144 = vst [vmem:[#allocation2 + $0x10] sm:$0xf] %v2142_v26  ;;  %v2734_v53 = vpop.f32.mrb[34].mxu0  ;;  %v2839_v26 = vmul.f32 %v2838_v14, %v4071_v15 }
 0x1f9   :  { %v2476_v39 = vadd.f32 %v2475_v56, %v2472_v61  ;;  %v2805_v16 = vpop.f32.mrb[34].mxu1  ;;  %v2736_v46 = vpop.f32.mrb[35].mxu0  ;;  %v3175_v2 = vadd.f32 %v3172_v36, %v3171_v1  ;;  %v2828_v49 = vmul.f32 %v2827_v7, %v2734_v53  ;;  %v3184_v7 = vsub.f32 %v4059_v59, %v4038_v25 }
 0x1fa   :  { %v2810_v47 = vmul.f32 %v4038_v25, %v2805_v16  ;;  %v2807_v51 = vpop.f32.mrb[35].mxu1  ;;  %v2832_v10 = vmul.f32 %v2831_v60, %v2736_v46 }
 0x1fb   :  { %v2480_v57 = vadd.f32 %v2479_v20, %v2476_v39  ;;  %v3179_v22 = vadd.f32 %v3176_v3, %v3175_v2  ;;  %v2836_v54 = vmul.f32 %v2835_v13, %v2807_v51 }
 0x1fc   :  { %v2813_v9 = vadd.f32 %v2812_v27, %v2810_v47 }
 0x1fd   :  { %v2484_v45 = vadd.f32 %v2483_v11, %v2480_v57  ;;  %v2941_v23 = vpop.f32.mrb[36].mxu0 }
 0x1fe   :  { %v2817_v62 = vadd.f32 %v2816_v48, %v2813_v9  ;;  %v3012_v29 = vpop.f32.mrb[36].mxu1  ;;  %v2943_v4 = vpop.f32.mrb[37].mxu0  ;;  %v3161_v24 = vmul.f32 %v4172_v42, %v2941_v23  ;;  %v3183_v42 = vadd.f32 %v3180_v21, %v3179_v22 }
 0x1ff   :  { %v2488_v38 = vadd.f32 %v2487_v63, %v2484_v45  ;;  %v3014_v5 = vpop.f32.mrb[37].mxu1  ;;  %v3165_v19 = vmul.f32 %v3164_v37, %v2943_v4  ;;  %v3169_v61 = vmul.f32 %v3168_v8, %v3012_v29 }
 0x200   :  { %v2821_v28 = vadd.f32 %v2820_v41, %v2817_v62  ;;  %v3173_v53 = vmul.f32 %v3172_v36, %v3014_v5  ;;  %v3187_v16 = vadd.f32 %v3184_v7, %v3183_v42 }
 0x201   :  { %v2491_v12 = vadd.f32 %v2490_v0, %v2488_v38 }
 0x202   :  { %v2825_v50 = vadd.f32 %v2824_v52, %v2821_v28  ;;  %v3083_v58 = vpop.f32.mrb[38].mxu0  ;;  %v3188_v43 = vmul.f32 %v3187_v16, %v4071_v15 }
 0x203   :  { %2493 = vst [vmem:[#allocation2 + $0x14] sm:$0xf] %v2491_v12  ;;  %v3154_v34 = vpop.f32.mrb[38].mxu1  ;;  %v3085_v44 = vpop.f32.mrb[39].mxu0  ;;  %v3177_v39 = vmul.f32 %v3176_v3, %v3083_v58 }
 0x204   :  { %v2829_v6 = vadd.f32 %v2828_v49, %v2825_v50  ;;  %v3156_v40 = vpop.f32.mrb[39].mxu1  ;;  %v3181_v17 = vmul.f32 %v3180_v21, %v3085_v44  ;;  %v3185_v37 = vmul.f32 %v3184_v7, %v3154_v34 }
 0x205   :  { %v3159_v32 = vmul.f32 %v4059_v59, %v3156_v40 }
 0x206   :  { %v2833_v33 = vadd.f32 %v2832_v10, %v2829_v6 }
 0x207   :  { %v3162_v55 = vadd.f32 %v3161_v24, %v3159_v32 }
 0x208   :  { %v2837_v56 = vadd.f32 %v2836_v54, %v2833_v33 }
 0x209   :  { %v3166_v35 = vadd.f32 %v3165_v19, %v3162_v55 }
 0x20a   :  { %v2840_v27 = vadd.f32 %v2839_v26, %v2837_v56 }
 0x20b   :  { %v3170_v20 = vadd.f32 %v3169_v61, %v3166_v35 }
 0x20c   :  { %2842 = vst [vmem:[#allocation2 + $0x18] sm:$0xf] %v2840_v27 }
 0x20d   :  { %v3174_v18 = vadd.f32 %v3173_v53, %v3170_v20 }
 0x20f   :  { %v3178_v46 = vadd.f32 %v3177_v39, %v3174_v18 }
 0x211   :  { %v3182_v47 = vadd.f32 %v3181_v17, %v3178_v46 }
 0x213   :  { %v3186_v48 = vadd.f32 %v3185_v37, %v3182_v47 }
 0x215   :  { %v3189_v51 = vadd.f32 %v3188_v43, %v3186_v48 }
 0x217   :  { %3191 = vst [vmem:[#allocation2 + $0x1c] sm:$0xf] %v3189_v51 }
 0x218   :  { %3417 = shalt.err (!%p3414_p4)
}
 0x219   :  { %s3418_s12 = scalar_lea.hbm %s4225_s5, 512 }
 0x21a   :  { %p3419_p5 = scmp.ne.s32.totalorder %s4225_s5, %s3418_s12  ;;  %p3422_p6 = scmp.lt.u32.totalorder %s3418_s12, %s4225_s5 }
 0x21c   :  { %p3424_p7 = pnand %p3422_p6, %p3419_p5 }
 0x21e   :  { %3427 = shalt.err (!%p3424_p7)
}
 0x21f   :  { %s3433_s16 = smov 64   ;;  %s3434_s2 = smov 4  }
 0x220   :  { %3203 = dma.vmem_to_hbm [thread:$0]  %s3198_s8, 512, %s4225_s5, [#allocation3], %s3433_s16, %s3433_s16, %s3434_s2  }
 0x221   :  { %3428 = dma.done.wait [#allocation3], 512  }
 0x222   :  { %3429 = vsyncadd [#allocation3], 4294966784 }
 0x223   :  { %3207 = vsyncpa [#allocation3], 1 }

</bundles_post_ra>
